<compile_context>
chip_gen: v7x
topology: tpu7x:2x2x1
jax: 0.10.0
libtpu: 0.0.40
codegen_flags: <defaults>
</compile_context>

<pallas_src>
import functools

import jax
import jax.numpy as jnp
import numpy as np
from jax.experimental import pallas as pl
from jax.experimental.pallas import tpu as pltpu


def _cat_kernel(x_ref, wf_ref, wp_ref, bp_ref, out_ref, *, seq_len):
    # x_ref:  (Bt*N, C)   block of Bt batch elements, rows on sublanes, C on lanes
    # wf_ref: (C, 2*C)    fused [ W_V.T | expand_per_head(W_A.T) ]
    # wp_ref: (C, C)      proj.weight.T
    # bp_ref: (1, C)      proj.bias
    # out_ref:(Bt*N, C)
    rows, c = x_ref.shape
    n = seq_len
    bt = rows // n

    x = x_ref[...]

    # --- single fused MXU pass over x:  [V | Z] = x @ [wv | wa_expanded] -------
    y = jnp.dot(x, wf_ref[...], preferred_element_type=jnp.float32)   # (rows, 2C)
    v3 = y[:, :c].reshape(bt, n, c)        # (Bt, N, C)  values
    z3 = y[:, c:].reshape(bt, n, c)        # (Bt, N, C)  per-channel head logits
                                           # (identical within a head -> identical softmax)

    # --- softmax over the sequence axis per (batch, channel) -------------------
    # 1/N folded into the denominator; reciprocal on the EUP.
    m = jnp.max(z3, axis=1, keepdims=True)
    e = jnp.exp(z3 - m)
    denom = jnp.sum(e, axis=1, keepdims=True) * float(n)
    w = e * pl.reciprocal(denom, approx=True)          # (Bt, N, C) == z_star / N

    # --- circulant apply as shift-and-accumulate (no roll matrix) --------------
    #   out[b, i, c] = sum_s w[b, s, c] * V[b, (i + s) % N, c]
    acc = w[:, 0:1, :] * v3                             # s = 0 term
    for s in range(1, n):                               # static shifts, unrolled
        v_roll = jnp.concatenate([v3[:, s:, :], v3[:, :s, :]], axis=1)
        acc = acc + w[:, s:s + 1, :] * v_roll

    # --- output projection ------------------------------------------------------
    out2 = acc.reshape(rows, c)                         # back to (Bt*N, C)
    proj = jnp.dot(out2, wp_ref[...], preferred_element_type=jnp.float32)
    proj = proj + bp_ref[...]
    out_ref[...] = proj.astype(out_ref.dtype)


def _pick_block_b(B, N, target_rows=256, max_rows=1024):
    """Pick how many batch elements go into one grid step.

    Constraints: Bt divides B; Bt*N is sublane-aligned (mult of 8) unless Bt==B;
    prefer >= 2 grid steps (keeps both v7x TensorCores busy) and Bt*N large
    enough to fill the MXU's M dimension, without blowing up VMEM.
    """
    divs = [d for d in range(1, B + 1) if B % d == 0]
    cand = [d for d in divs if (d * N) % 8 == 0] or [B]
    multi = [d for d in cand if B // d >= 2]
    pool = multi if multi else cand
    fits = [d for d in pool if d * N <= max_rows]
    pool = fits if fits else [min(pool)]
    reaching = [d for d in pool if d * N >= target_rows]
    return min(reaching) if reaching else max(pool)


def circular_conv_attention(x, wa, wv, wp, bp, *, block_b=None):
    B, N, C = x.shape
    H = wa.shape[1]
    assert C % H == 0, "dim must be divisible by num_heads"
    hd = C // H

    bt = block_b if block_b is not None else _pick_block_b(B, N)
    assert B % bt == 0

    # Host-side (one-time) weight prep:
    #  - expand W_A columns per head: column c of wa_exp is wa[:, c // hd]
    #  - fuse with W_V into a single (C, 2C) matmul operand
    wa_exp = jnp.repeat(wa, hd, axis=1)                 # (C, C)
    wf = jnp.concatenate([wv, wa_exp], axis=1)          # (C, 2C)
    bp2 = bp.reshape(1, C)

    # Row-major identity reshape: present sublane-dense (rows, C) slabs.
    x2 = x.reshape(B * N, C)
    rows_blk = bt * N

    out2 = pl.pallas_call(
        functools.partial(_cat_kernel, seq_len=N),
        out_shape=jax.ShapeDtypeStruct((B * N, C), x.dtype),
        grid_spec=pltpu.PrefetchScalarGridSpec(
            num_scalar_prefetch=0,
            grid=(B // bt,),
            in_specs=[
                pl.BlockSpec((rows_blk, C), lambda b: (b, 0)),
                pl.BlockSpec((C, 2 * C), lambda b: (0, 0)),
                pl.BlockSpec((C, C), lambda b: (0, 0)),
                pl.BlockSpec((1, C), lambda b: (0, 0)),
            ],
            out_specs=pl.BlockSpec((rows_blk, C), lambda b: (b, 0)),
        ),
        compiler_params=pltpu.CompilerParams(
            dimension_semantics=("parallel",)),
    )(x2, wf, wp, bp2)
    return out2.reshape(B, N, C)


def circular_conv_attention_ref(x, wa, wv, wp, bp):
    """Pure-JAX reference mirroring the PyTorch module."""
    B, N, C = x.shape
    H = wa.shape[1]
    hd = C // H
    z = x @ wa                                   # (B, N, H)
    z = jnp.transpose(z, (0, 2, 1))              # (B, H, N)
    z_star = jax.nn.softmax(z, axis=-1)          # (B, H, N)
    col = jnp.arange(N)
    row = jnp.arange(N)
    idx = (col[None, :] - row[:, None]) % N      # (N, N)
    roll = z_star[:, :, idx] / N                 # (B, H, N, N)
    V = (x @ wv).reshape(B, N, H, hd).transpose(0, 2, 1, 3)   # (B, H, N, hd)
    out = jnp.einsum('bhij,bhjd->bhid', roll, V)              # (B, H, N, hd)
    out = out.transpose(0, 2, 1, 3).reshape(B, N, C)
    return out @ wp + bp[None, None, :]


if __name__ == "__main__":
    B, N, C, H = 8, 16, 32, 8   # dim=32, num_heads=8, head_dim=4

    key = jax.random.PRNGKey(0)
    kx, ka, kv, kp, kb = jax.random.split(key, 5)
    x = jax.random.normal(kx, (B, N, C), dtype=jnp.float32)
    # Deterministic parameter init (already transposed for `x @ W` form).
    wa = jax.random.normal(ka, (C, H), dtype=jnp.float32) * 0.1   # W_A.weight.T (qkv_bias=False)
    wv = jax.random.normal(kv, (C, C), dtype=jnp.float32) * 0.1   # W_V.weight.T
    wp = jax.random.normal(kp, (C, C), dtype=jnp.float32) * 0.1   # proj.weight.T
    bp = jax.random.normal(kb, (C,), dtype=jnp.float32) * 0.1     # proj.bias

    out = jax.block_until_ready(circular_conv_attention(x, wa, wv, wp, bp))

    ref = circular_conv_attention_ref(x, wa, wv, wp, bp)
    # Tolerance loosened slightly vs 1e-5 because the softmax denominator uses
    # the EUP approximate reciprocal (rel err ~1e-4), as suggested by the review.
    np.testing.assert_allclose(np.asarray(out), np.asarray(ref), rtol=2e-3, atol=2e-3)

    print("KERNEL_OK")
</pallas_src>

<mosaic_0001>
module attributes {stable_mosaic.version = 11 : i64} {
  func.func @_cat_kernel(%arg0: i32, %arg1: memref<64x32xf32, #tpu.memory_space<vmem>>, %arg2: memref<32x64xf32, #tpu.memory_space<vmem>>, %arg3: memref<32x32xf32, #tpu.memory_space<vmem>>, %arg4: memref<1x32xf32, #tpu.memory_space<vmem>>, %arg5: memref<64x32xf32, #tpu.memory_space<vmem>>) attributes {dimension_semantics = [#tpu.dimension_semantics<parallel>], iteration_bounds = array<i64: 2>, scalar_prefetch = 0 : i64, scratch_operands = 0 : i64, tpu.core_type = #tpu.core_type<tc>, window_params = [{transform_indices = @transform_0, window_bounds = array<i64: 64, 32>}, {pipeline_mode = #tpu.pipeline_mode<synchronous>, transform_indices = @transform_1, window_bounds = array<i64: 32, 64>}, {pipeline_mode = #tpu.pipeline_mode<synchronous>, transform_indices = @transform_2, window_bounds = array<i64: 32, 32>}, {pipeline_mode = #tpu.pipeline_mode<synchronous>, transform_indices = @transform_3, window_bounds = array<i64: 1, 32>}, {transform_indices = @transform_4, window_bounds = array<i64: 64, 32>}]} {
    %c0 = arith.constant 0 : index
    %c0_0 = arith.constant 0 : index
    %0 = vector.load %arg1[%c0, %c0_0] : memref<64x32xf32, #tpu.memory_space<vmem>>, vector<64x32xf32>
    %c0_1 = arith.constant 0 : index
    %c0_2 = arith.constant 0 : index
    %1 = vector.load %arg2[%c0_1, %c0_2] : memref<32x64xf32, #tpu.memory_space<vmem>>, vector<32x64xf32>
    %cst = arith.constant dense<0.000000e+00> : vector<64x64xf32>
    %2 = tpu.matmul %0, %1, %cst {dimension_numbers = #tpu.dot_dimension_numbers<[1], [0], [0], [1], [0, 0, 1, 1], [], []>} : vector<64x32xf32>, vector<32x64xf32>, vector<64x64xf32> -> vector<64x64xf32>
    %3 = vector.extract_strided_slice %2 {offsets = [0, 0], sizes = [64, 32], strides = [1, 1]} : vector<64x64xf32> to vector<64x32xf32>
    %4 = vector.shape_cast %3 : vector<64x32xf32> to vector<4x16x32xf32>
    %5 = vector.extract_strided_slice %2 {offsets = [0, 32], sizes = [64, 32], strides = [1, 1]} : vector<64x64xf32> to vector<64x32xf32>
    %6 = vector.shape_cast %5 : vector<64x32xf32> to vector<4x16x32xf32>
    %cst_3 = arith.constant dense<0xFF800000> : vector<4x32xf32>
    %7 = vector.multi_reduction <maximumf>, %6, %cst_3 [1] : vector<4x16x32xf32> to vector<4x32xf32>
    %8 = vector.shape_cast %7 : vector<4x32xf32> to vector<4x1x32xf32>
    %9 = vector.broadcast %8 : vector<4x1x32xf32> to vector<4x16x32xf32>
    %10 = arith.subf %6, %9 : vector<4x16x32xf32>
    %11 = math.exp %10 : vector<4x16x32xf32>
    %cst_4 = arith.constant dense<0.000000e+00> : vector<4x32xf32>
    %12 = vector.multi_reduction <add>, %11, %cst_4 [1] : vector<4x16x32xf32> to vector<4x32xf32>
    %13 = vector.shape_cast %12 : vector<4x32xf32> to vector<4x1x32xf32>
    %cst_5 = arith.constant 1.600000e+01 : f32
    %14 = vector.broadcast %cst_5 : f32 to vector<4x1x32xf32>
    %15 = arith.mulf %13, %14 : vector<4x1x32xf32>
    %16 = tpu.reciprocal %15 {approx = true} : vector<4x1x32xf32> -> vector<4x1x32xf32>
    %17 = vector.broadcast %16 : vector<4x1x32xf32> to vector<4x16x32xf32>
    %18 = arith.mulf %11, %17 : vector<4x16x32xf32>
    %19 = vector.extract_strided_slice %18 {offsets = [0, 0, 0], sizes = [4, 1, 32], strides = [1, 1, 1]} : vector<4x16x32xf32> to vector<4x1x32xf32>
    %20 = vector.broadcast %19 : vector<4x1x32xf32> to vector<4x16x32xf32>
    %21 = arith.mulf %20, %4 : vector<4x16x32xf32>
    %22 = vector.extract_strided_slice %4 {offsets = [0, 1, 0], sizes = [4, 15, 32], strides = [1, 1, 1]} : vector<4x16x32xf32> to vector<4x15x32xf32>
    %23 = vector.extract_strided_slice %4 {offsets = [0, 0, 0], sizes = [4, 1, 32], strides = [1, 1, 1]} : vector<4x16x32xf32> to vector<4x1x32xf32>
    %24 = tpu.concatenate %22, %23 in 1 : vector<4x15x32xf32>, vector<4x1x32xf32> -> vector<4x16x32xf32>
    %25 = vector.extract_strided_slice %18 {offsets = [0, 1, 0], sizes = [4, 1, 32], strides = [1, 1, 1]} : vector<4x16x32xf32> to vector<4x1x32xf32>
    %26 = vector.broadcast %25 : vector<4x1x32xf32> to vector<4x16x32xf32>
    %27 = arith.mulf %26, %24 : vector<4x16x32xf32>
    %28 = arith.addf %21, %27 : vector<4x16x32xf32>
    %29 = vector.extract_strided_slice %4 {offsets = [0, 2, 0], sizes = [4, 14, 32], strides = [1, 1, 1]} : vector<4x16x32xf32> to vector<4x14x32xf32>
    %30 = vector.extract_strided_slice %4 {offsets = [0, 0, 0], sizes = [4, 2, 32], strides = [1, 1, 1]} : vector<4x16x32xf32> to vector<4x2x32xf32>
    %31 = tpu.concatenate %29, %30 in 1 : vector<4x14x32xf32>, vector<4x2x32xf32> -> vector<4x16x32xf32>
    %32 = vector.extract_strided_slice %18 {offsets = [0, 2, 0], sizes = [4, 1, 32], strides = [1, 1, 1]} : vector<4x16x32xf32> to vector<4x1x32xf32>
    %33 = vector.broadcast %32 : vector<4x1x32xf32> to vector<4x16x32xf32>
    %34 = arith.mulf %33, %31 : vector<4x16x32xf32>
    %35 = arith.addf %28, %34 : vector<4x16x32xf32>
    %36 = vector.extract_strided_slice %4 {offsets = [0, 3, 0], sizes = [4, 13, 32], strides = [1, 1, 1]} : vector<4x16x32xf32> to vector<4x13x32xf32>
    %37 = vector.extract_strided_slice %4 {offsets = [0, 0, 0], sizes = [4, 3, 32], strides = [1, 1, 1]} : vector<4x16x32xf32> to vector<4x3x32xf32>
    %38 = tpu.concatenate %36, %37 in 1 : vector<4x13x32xf32>, vector<4x3x32xf32> -> vector<4x16x32xf32>
    %39 = vector.extract_strided_slice %18 {offsets = [0, 3, 0], sizes = [4, 1, 32], strides = [1, 1, 1]} : vector<4x16x32xf32> to vector<4x1x32xf32>
    %40 = vector.broadcast %39 : vector<4x1x32xf32> to vector<4x16x32xf32>
    %41 = arith.mulf %40, %38 : vector<4x16x32xf32>
    %42 = arith.addf %35, %41 : vector<4x16x32xf32>
    %43 = vector.extract_strided_slice %4 {offsets = [0, 4, 0], sizes = [4, 12, 32], strides = [1, 1, 1]} : vector<4x16x32xf32> to vector<4x12x32xf32>
    %44 = vector.extract_strided_slice %4 {offsets = [0, 0, 0], sizes = [4, 4, 32], strides = [1, 1, 1]} : vector<4x16x32xf32> to vector<4x4x32xf32>
    %45 = tpu.concatenate %43, %44 in 1 : vector<4x12x32xf32>, vector<4x4x32xf32> -> vector<4x16x32xf32>
    %46 = vector.extract_strided_slice %18 {offsets = [0, 4, 0], sizes = [4, 1, 32], strides = [1, 1, 1]} : vector<4x16x32xf32> to vector<4x1x32xf32>
    %47 = vector.broadcast %46 : vector<4x1x32xf32> to vector<4x16x32xf32>
    %48 = arith.mulf %47, %45 : vector<4x16x32xf32>
    %49 = arith.addf %42, %48 : vector<4x16x32xf32>
    %50 = vector.extract_strided_slice %4 {offsets = [0, 5, 0], sizes = [4, 11, 32], strides = [1, 1, 1]} : vector<4x16x32xf32> to vector<4x11x32xf32>
    %51 = vector.extract_strided_slice %4 {offsets = [0, 0, 0], sizes = [4, 5, 32], strides = [1, 1, 1]} : vector<4x16x32xf32> to vector<4x5x32xf32>
    %52 = tpu.concatenate %50, %51 in 1 : vector<4x11x32xf32>, vector<4x5x32xf32> -> vector<4x16x32xf32>
    %53 = vector.extract_strided_slice %18 {offsets = [0, 5, 0], sizes = [4, 1, 32], strides = [1, 1, 1]} : vector<4x16x32xf32> to vector<4x1x32xf32>
    %54 = vector.broadcast %53 : vector<4x1x32xf32> to vector<4x16x32xf32>
    %55 = arith.mulf %54, %52 : vector<4x16x32xf32>
    %56 = arith.addf %49, %55 : vector<4x16x32xf32>
    %57 = vector.extract_strided_slice %4 {offsets = [0, 6, 0], sizes = [4, 10, 32], strides = [1, 1, 1]} : vector<4x16x32xf32> to vector<4x10x32xf32>
    %58 = vector.extract_strided_slice %4 {offsets = [0, 0, 0], sizes = [4, 6, 32], strides = [1, 1, 1]} : vector<4x16x32xf32> to vector<4x6x32xf32>
    %59 = tpu.concatenate %57, %58 in 1 : vector<4x10x32xf32>, vector<4x6x32xf32> -> vector<4x16x32xf32>
    %60 = vector.extract_strided_slice %18 {offsets = [0, 6, 0], sizes = [4, 1, 32], strides = [1, 1, 1]} : vector<4x16x32xf32> to vector<4x1x32xf32>
    %61 = vector.broadcast %60 : vector<4x1x32xf32> to vector<4x16x32xf32>
    %62 = arith.mulf %61, %59 : vector<4x16x32xf32>
    %63 = arith.addf %56, %62 : vector<4x16x32xf32>
    %64 = vector.extract_strided_slice %4 {offsets = [0, 7, 0], sizes = [4, 9, 32], strides = [1, 1, 1]} : vector<4x16x32xf32> to vector<4x9x32xf32>
    %65 = vector.extract_strided_slice %4 {offsets = [0, 0, 0], sizes = [4, 7, 32], strides = [1, 1, 1]} : vector<4x16x32xf32> to vector<4x7x32xf32>
    %66 = tpu.concatenate %64, %65 in 1 : vector<4x9x32xf32>, vector<4x7x32xf32> -> vector<4x16x32xf32>
    %67 = vector.extract_strided_slice %18 {offsets = [0, 7, 0], sizes = [4, 1, 32], strides = [1, 1, 1]} : vector<4x16x32xf32> to vector<4x1x32xf32>
    %68 = vector.broadcast %67 : vector<4x1x32xf32> to vector<4x16x32xf32>
    %69 = arith.mulf %68, %66 : vector<4x16x32xf32>
    %70 = arith.addf %63, %69 : vector<4x16x32xf32>
    %71 = vector.extract_strided_slice %4 {offsets = [0, 8, 0], sizes = [4, 8, 32], strides = [1, 1, 1]} : vector<4x16x32xf32> to vector<4x8x32xf32>
    %72 = vector.extract_strided_slice %4 {offsets = [0, 0, 0], sizes = [4, 8, 32], strides = [1, 1, 1]} : vector<4x16x32xf32> to vector<4x8x32xf32>
    %73 = tpu.concatenate %71, %72 in 1 : vector<4x8x32xf32>, vector<4x8x32xf32> -> vector<4x16x32xf32>
    %74 = vector.extract_strided_slice %18 {offsets = [0, 8, 0], sizes = [4, 1, 32], strides = [1, 1, 1]} : vector<4x16x32xf32> to vector<4x1x32xf32>
    %75 = vector.broadcast %74 : vector<4x1x32xf32> to vector<4x16x32xf32>
    %76 = arith.mulf %75, %73 : vector<4x16x32xf32>
    %77 = arith.addf %70, %76 : vector<4x16x32xf32>
    %78 = vector.extract_strided_slice %4 {offsets = [0, 9, 0], sizes = [4, 7, 32], strides = [1, 1, 1]} : vector<4x16x32xf32> to vector<4x7x32xf32>
    %79 = vector.extract_strided_slice %4 {offsets = [0, 0, 0], sizes = [4, 9, 32], strides = [1, 1, 1]} : vector<4x16x32xf32> to vector<4x9x32xf32>
    %80 = tpu.concatenate %78, %79 in 1 : vector<4x7x32xf32>, vector<4x9x32xf32> -> vector<4x16x32xf32>
    %81 = vector.extract_strided_slice %18 {offsets = [0, 9, 0], sizes = [4, 1, 32], strides = [1, 1, 1]} : vector<4x16x32xf32> to vector<4x1x32xf32>
    %82 = vector.broadcast %81 : vector<4x1x32xf32> to vector<4x16x32xf32>
    %83 = arith.mulf %82, %80 : vector<4x16x32xf32>
    %84 = arith.addf %77, %83 : vector<4x16x32xf32>
    %85 = vector.extract_strided_slice %4 {offsets = [0, 10, 0], sizes = [4, 6, 32], strides = [1, 1, 1]} : vector<4x16x32xf32> to vector<4x6x32xf32>
    %86 = vector.extract_strided_slice %4 {offsets = [0, 0, 0], sizes = [4, 10, 32], strides = [1, 1, 1]} : vector<4x16x32xf32> to vector<4x10x32xf32>
    %87 = tpu.concatenate %85, %86 in 1 : vector<4x6x32xf32>, vector<4x10x32xf32> -> vector<4x16x32xf32>
    %88 = vector.extract_strided_slice %18 {offsets = [0, 10, 0], sizes = [4, 1, 32], strides = [1, 1, 1]} : vector<4x16x32xf32> to vector<4x1x32xf32>
    %89 = vector.broadcast %88 : vector<4x1x32xf32> to vector<4x16x32xf32>
    %90 = arith.mulf %89, %87 : vector<4x16x32xf32>
    %91 = arith.addf %84, %90 : vector<4x16x32xf32>
    %92 = vector.extract_strided_slice %4 {offsets = [0, 11, 0], sizes = [4, 5, 32], strides = [1, 1, 1]} : vector<4x16x32xf32> to vector<4x5x32xf32>
    %93 = vector.extract_strided_slice %4 {offsets = [0, 0, 0], sizes = [4, 11, 32], strides = [1, 1, 1]} : vector<4x16x32xf32> to vector<4x11x32xf32>
    %94 = tpu.concatenate %92, %93 in 1 : vector<4x5x32xf32>, vector<4x11x32xf32> -> vector<4x16x32xf32>
    %95 = vector.extract_strided_slice %18 {offsets = [0, 11, 0], sizes = [4, 1, 32], strides = [1, 1, 1]} : vector<4x16x32xf32> to vector<4x1x32xf32>
    %96 = vector.broadcast %95 : vector<4x1x32xf32> to vector<4x16x32xf32>
    %97 = arith.mulf %96, %94 : vector<4x16x32xf32>
    %98 = arith.addf %91, %97 : vector<4x16x32xf32>
    %99 = vector.extract_strided_slice %4 {offsets = [0, 12, 0], sizes = [4, 4, 32], strides = [1, 1, 1]} : vector<4x16x32xf32> to vector<4x4x32xf32>
    %100 = vector.extract_strided_slice %4 {offsets = [0, 0, 0], sizes = [4, 12, 32], strides = [1, 1, 1]} : vector<4x16x32xf32> to vector<4x12x32xf32>
    %101 = tpu.concatenate %99, %100 in 1 : vector<4x4x32xf32>, vector<4x12x32xf32> -> vector<4x16x32xf32>
    %102 = vector.extract_strided_slice %18 {offsets = [0, 12, 0], sizes = [4, 1, 32], strides = [1, 1, 1]} : vector<4x16x32xf32> to vector<4x1x32xf32>
    %103 = vector.broadcast %102 : vector<4x1x32xf32> to vector<4x16x32xf32>
    %104 = arith.mulf %103, %101 : vector<4x16x32xf32>
    %105 = arith.addf %98, %104 : vector<4x16x32xf32>
    %106 = vector.extract_strided_slice %4 {offsets = [0, 13, 0], sizes = [4, 3, 32], strides = [1, 1, 1]} : vector<4x16x32xf32> to vector<4x3x32xf32>
    %107 = vector.extract_strided_slice %4 {offsets = [0, 0, 0], sizes = [4, 13, 32], strides = [1, 1, 1]} : vector<4x16x32xf32> to vector<4x13x32xf32>
    %108 = tpu.concatenate %106, %107 in 1 : vector<4x3x32xf32>, vector<4x13x32xf32> -> vector<4x16x32xf32>
    %109 = vector.extract_strided_slice %18 {offsets = [0, 13, 0], sizes = [4, 1, 32], strides = [1, 1, 1]} : vector<4x16x32xf32> to vector<4x1x32xf32>
    %110 = vector.broadcast %109 : vector<4x1x32xf32> to vector<4x16x32xf32>
    %111 = arith.mulf %110, %108 : vector<4x16x32xf32>
    %112 = arith.addf %105, %111 : vector<4x16x32xf32>
    %113 = vector.extract_strided_slice %4 {offsets = [0, 14, 0], sizes = [4, 2, 32], strides = [1, 1, 1]} : vector<4x16x32xf32> to vector<4x2x32xf32>
    %114 = vector.extract_strided_slice %4 {offsets = [0, 0, 0], sizes = [4, 14, 32], strides = [1, 1, 1]} : vector<4x16x32xf32> to vector<4x14x32xf32>
    %115 = tpu.concatenate %113, %114 in 1 : vector<4x2x32xf32>, vector<4x14x32xf32> -> vector<4x16x32xf32>
    %116 = vector.extract_strided_slice %18 {offsets = [0, 14, 0], sizes = [4, 1, 32], strides = [1, 1, 1]} : vector<4x16x32xf32> to vector<4x1x32xf32>
    %117 = vector.broadcast %116 : vector<4x1x32xf32> to vector<4x16x32xf32>
    %118 = arith.mulf %117, %115 : vector<4x16x32xf32>
    %119 = arith.addf %112, %118 : vector<4x16x32xf32>
    %120 = vector.extract_strided_slice %4 {offsets = [0, 15, 0], sizes = [4, 1, 32], strides = [1, 1, 1]} : vector<4x16x32xf32> to vector<4x1x32xf32>
    %121 = vector.extract_strided_slice %4 {offsets = [0, 0, 0], sizes = [4, 15, 32], strides = [1, 1, 1]} : vector<4x16x32xf32> to vector<4x15x32xf32>
    %122 = tpu.concatenate %120, %121 in 1 : vector<4x1x32xf32>, vector<4x15x32xf32> -> vector<4x16x32xf32>
    %123 = vector.extract_strided_slice %18 {offsets = [0, 15, 0], sizes = [4, 1, 32], strides = [1, 1, 1]} : vector<4x16x32xf32> to vector<4x1x32xf32>
    %124 = vector.broadcast %123 : vector<4x1x32xf32> to vector<4x16x32xf32>
    %125 = arith.mulf %124, %122 : vector<4x16x32xf32>
    %126 = arith.addf %119, %125 : vector<4x16x32xf32>
    %127 = vector.shape_cast %126 : vector<4x16x32xf32> to vector<64x32xf32>
    %c0_6 = arith.constant 0 : index
    %c0_7 = arith.constant 0 : index
    %128 = vector.load %arg3[%c0_6, %c0_7] : memref<32x32xf32, #tpu.memory_space<vmem>>, vector<32x32xf32>
    %cst_8 = arith.constant dense<0.000000e+00> : vector<64x32xf32>
    %129 = tpu.matmul %127, %128, %cst_8 {dimension_numbers = #tpu.dot_dimension_numbers<[1], [0], [0], [1], [0, 0, 1, 1], [], []>} : vector<64x32xf32>, vector<32x32xf32>, vector<64x32xf32> -> vector<64x32xf32>
    %c0_9 = arith.constant 0 : index
    %c0_10 = arith.constant 0 : index
    %130 = vector.load %arg4[%c0_9, %c0_10] : memref<1x32xf32, #tpu.memory_space<vmem>>, vector<1x32xf32>
    %131 = vector.broadcast %130 : vector<1x32xf32> to vector<64x32xf32>
    %132 = arith.addf %129, %131 : vector<64x32xf32>
    %c0_11 = arith.constant 0 : index
    %c0_12 = arith.constant 0 : index
    %133 = vector.load %arg5[%c0_11, %c0_12] : memref<64x32xf32, #tpu.memory_space<vmem>>, vector<64x32xf32>
    tpu.vector_store %arg5[%c0_11, %c0_12], %132 {strides = array<i32>} : memref<64x32xf32, #tpu.memory_space<vmem>>, vector<64x32xf32>,
    return
  }
  func.func @transform_0(%arg0: i32) -> (i32, i32) {
    %c0_i32 = arith.constant 0 : i32
    %c0_i32_0 = arith.constant 0 : i32
    return %arg0, %c0_i32 : i32, i32
  }
  func.func @transform_1(%arg0: i32) -> (i32, i32) {
    %c0_i32 = arith.constant 0 : i32
    %c0_i32_0 = arith.constant 0 : i32
    %c0_i32_1 = arith.constant 0 : i32
    return %c0_i32, %c0_i32_0 : i32, i32
  }
  func.func @transform_2(%arg0: i32) -> (i32, i32) {
    %c0_i32 = arith.constant 0 : i32
    %c0_i32_0 = arith.constant 0 : i32
    %c0_i32_1 = arith.constant 0 : i32
    return %c0_i32, %c0_i32_0 : i32, i32
  }
  func.func @transform_3(%arg0: i32) -> (i32, i32) {
    %c0_i32 = arith.constant 0 : i32
    %c0_i32_0 = arith.constant 0 : i32
    %c0_i32_1 = arith.constant 0 : i32
    return %c0_i32, %c0_i32_0 : i32, i32
  }
  func.func @transform_4(%arg0: i32) -> (i32, i32) {
    %c0_i32 = arith.constant 0 : i32
    %c0_i32_0 = arith.constant 0 : i32
    return %arg0, %c0_i32 : i32, i32
  }
}

</mosaic_0001>

<bundles_post_ra>
// kernel: tpu_custom_call.1
= control target key start
LH: loop header
LB: loop body
LE: loop exit
PB: predicated region body
PF: predicated region fallthrough
CT: control target
= control target key end

     0   :  { %s1760_s15 = smov 0   ;;  %s2663_s0 = inlined_call_operand.vmem [shape: f32[128,32], index: 0, kind: input, shape index: {}]   ;;  %s2664_s1 = inlined_call_operand.vmem [shape: f32[32,64], index: 1, kind: input, shape index: {}]   ;;  %s2665_s2 = inlined_call_operand.vmem [shape: f32[32,32], index: 2, kind: input, shape index: {}]   ;;  %s2666_s3 = inlined_call_operand.vmem [shape: f32[1,32], index: 3, kind: input, shape index: {}]   ;;  %s2667_s4 = inlined_call_operand.vmem [shape: f32[128,32], index: 4, kind: output, shape index: {}]  }
   0x1 LB: > { %s1583_s16 = sadd.s32 4294967295, %s1731_s15   ;;  %p1587_p0 = scmp.ge.s32.totalorder %s1731_s15, 1  ;;  %s1731_s15 = sphi %s1760_s15, %s14_s15  }
   0x2   : > { %p163_p1 = scmp.lt.s32.totalorder %s1731_s15, 3 }
   0x4   : > { %p164_p2 = pnand %p1587_p0, %p163_p1 }
   0x6   : > { %167 = sbr.rel (%p164_p2) target bundleno = 828 (0x33c), region = 36 }
   0xd   : > { %v209_v0 = vld [vmem:[%s2664_s1] sm:$0xff]  ;;  %v210_v1 = vld [vmem:[%s2664_s1 + $0x8] sm:$0xff]  ;;  %v211_v2 = vld [vmem:[%s2664_s1 + $0x10] sm:$0xff]  ;;  %s1588_s23 = sshll.u32 %s1583_s16, 3  ;;  %vm213_vm0 = vcmask 261120   ;;  %vm343_vm1 = vcmask 523520  }
   0xe   : > { %v1675_v3 = vpack.c.bf16 %v210_v1, %v209_v0  ;;  %v212_v4 = vld [vmem:[%s2664_s1 + $0x18] sm:$0xff]  ;;  %p190_p3 = scmp.lt.s32.totalorder %s1588_s23, 15  ;;  %vm512_vm2 = vcmask 1046528   ;;  %vm597_vm3 = vcmask 1045504   ;;  %vm682_vm4 = vcmask 1044480   ;;  %s1733_s30 = smov 32  }
   0xf   : > { %v1679_v5 = vpack.c.bf16 %v212_v4, %v211_v2  ;;  %vm937_vm5 = vcmask 1041408   ;;  %vm767_vm6 = vcmask 1043456   ;;  %vm1022_vm7 = vcmask 1040384   ;;  %s1734_s13 = smov 96  }
  0x10   : > { %1676 = vmatprep.subr.bf16.mxu0 %v1675_v3  ;;  %s2735_s23 = smov (!%p190_p3, %s1588_s23), 15  ;;  %vm852_vm8 = vcmask 1042432  }
  0x11   : > { %1678 = vmatpush3.bf16.msra.mxu0 %v1675_v3  ;;  %s1589_s26 = sshll.u32 %s2735_s23, 3 }
  0x12   : > { %1680 = vmatprep.subr.bf16.mxu0 %v1679_v5  ;;  %s193_s29 = scalar_lea.vmem %s2663_s0, %s1589_s26  ;;  %s199_s19 = scalar_lea.vmem %s2667_s4, %s1589_s26 }
  0x13   : > { %v201_v6 = vld [vmem:[%s193_s29] sm:$0xff]  ;;  %v202_v7 = vld [vmem:[%s193_s29 + $0x8] sm:$0xff]  ;;  %v203_v8 = vld [vmem:[%s193_s29 + $0x10] sm:$0xff] }
  0x14   : > { %1643 = vmatprep.mubr.msk.f32.mxu0 %vm213_vm0, %v201_v6  ;;  %v204_v9 = vld [vmem:[%s193_s29 + $0x18] sm:$0xff]  ;;  %v205_v10 = vld [vmem:[%s193_s29 + $0x20] sm:$0xff]  ;;  %v206_v11 = vld [vmem:[%s193_s29 + $0x28] sm:$0xff] }
  0x15   : > { %1682 = vmatpush3.bf16.msra.mxu0 %v1679_v5  ;;  %v207_v12 = vld [vmem:[%s193_s29 + $0x30] sm:$0xff]  ;;  %v208_v13 = vld [vmem:[%s193_s29 + $0x38] sm:$0xff] }
  0x18   : > { %1644 = vmatmul.mubr.msk.f32.vlgmr.msra.gmra.mrb[0].mxu0 %vm213_vm0, %v202_v7 }
  0x19   : > { %1646 = vmatprep.mubr.msk.f32.mxu0 %vm213_vm0, %v203_v8 }
  0x1c   : > { %1647 = vmatmul.mubr.msk.f32.gmra.mrb[2].mxu0 %vm213_vm0, %v204_v9 }
  0x1d   : > { %1649 = vmatprep.mubr.msk.f32.mxu0 %vm213_vm0, %v205_v10 }
  0x20   : > { %1650 = vmatmul.mubr.msk.f32.gmra.mrb[4].mxu0 %vm213_vm0, %v206_v11 }
  0x21   : > { %1652 = vmatprep.mubr.msk.f32.mxu0 %vm213_vm0, %v207_v12 }
  0x24   : > { %1653 = vmatmul.mubr.msk.f32.gmra.mrb[6].mxu0 %vm213_vm0, %v208_v13 }
  0xeb   : > { %v1796_v14 = vpop.f32.mrb[0].mxu0 }
  0xec   : > { %v345_v15 = vsel %vm343_vm1, %v1796_v14, -inf  ;;  %482 = vrot.lane.b32.xlu1 %v1796_v14, %s1733_s30  ;;  %v1802_v16 = vpop.f32.mrb[1].mxu0  ;;  %v514_v17 = vrot.slane %v1796_v14, 1  ;;  %v599_v18 = vrot.slane %v1796_v14, 2  ;;  %v684_v19 = vrot.slane %v1796_v14, 3 }
  0xed   : > { %v344_v20 = vsel %vm343_vm1, %v1802_v16, -inf  ;;  %480 = vrot.lane.b32.xlu0 %v1802_v16, %s1733_s30  ;;  %v513_v21 = vrot.slane %v1802_v16, 1  ;;  %v598_v22 = vrot.slane %v1802_v16, 2  ;;  %v683_v23 = vrot.slane %v1802_v16, 3 }
  0xee   : > { %v346_v24 = vmax.f32 %v344_v20, %v345_v15  ;;  %v938_v25 = vrot.slane %v1802_v16, 6  ;;  %v939_v26 = vrot.slane %v1796_v14, 6  ;;  %v768_v27 = vrot.slane %v1802_v16, 4 }
  0xef   : > { %v1817_v28 = vpop.f32.mrb[2].mxu0  ;;  %v533_v29 = vsel %vm512_vm2, %v514_v17, %v513_v21  ;;  %v515_v30 = vsel %vm512_vm2, %v513_v21, %v514_v17  ;;  %v618_v31 = vsel %vm597_vm3, %v599_v18, %v598_v22  ;;  %v600_v32 = vsel %vm597_vm3, %v598_v22, %v599_v18 }
  0xf0   : > { %v347_v33 = vrot.slane %v346_v24, 4  ;;  %v354_v34 = vsel %vm343_vm1, %v1817_v28, -inf  ;;  %559 = vrot.lane.b32.xlu1 %v533_v29, %s1733_s30  ;;  %v1826_v35 = vpop.f32.mrb[3].mxu0  ;;  %v685_v36 = vsel %vm682_vm4, %v683_v23, %v684_v19  ;;  %v703_v37 = vsel %vm682_vm4, %v684_v19, %v683_v23 }
  0xf1   : > { %v353_v38 = vsel %vm343_vm1, %v1826_v35, -inf  ;;  %557 = vrot.lane.b32.xlu0 %v515_v30, %s1733_s30  ;;  %v940_v39 = vsel %vm937_vm5, %v938_v25, %v939_v26  ;;  %v769_v40 = vrot.slane %v1796_v14, 4  ;;  %v1023_v41 = vrot.slane %v1802_v16, 7 }
  0xf2   : > { %v348_v42 = vmax.f32 %v346_v24, %v347_v33  ;;  %v355_v43 = vmax.f32 %v353_v38, %v354_v34  ;;  %v1024_v44 = vrot.slane %v1796_v14, 7  ;;  %v853_v45 = vrot.slane %v1802_v16, 5 }
  0xf3   : > { %v1838_v46 = vpop.f32.mrb[4].mxu0  ;;  %v1841_v47 = vsel %vm767_vm6, %v768_v27, %v769_v40  ;;  %v1844_v48 = vsel %vm767_vm6, %v769_v40, %v768_v27  ;;  %v854_v49 = vrot.slane %v1796_v14, 5  ;;  %v516_v50 = vrot.slane %v1826_v35, 1 }
  0xf4   : > { %v349_v51 = vrot.slane %v348_v42, 2  ;;  %v356_v52 = vrot.slane %v355_v43, 4  ;;  %v363_v53 = vsel %vm343_vm1, %v1838_v46, -inf  ;;  %644 = vrot.lane.b32.xlu1 %v618_v31, %s1733_s30  ;;  %v1851_v54 = vpop.f32.mrb[5].mxu0  ;;  %v1025_v55 = vsel %vm1022_vm7, %v1023_v41, %v1024_v44 }
  0xf5   : > { %v362_v56 = vsel %vm343_vm1, %v1851_v54, -inf  ;;  %642 = vrot.lane.b32.xlu0 %v600_v32, %s1733_s30  ;;  %v1858_v57 = vsel %vm852_vm8, %v853_v45, %v854_v49  ;;  %v517_v58 = vrot.slane %v1817_v28, 1  ;;  %v1862_v59 = vsel %vm852_vm8, %v854_v49, %v853_v45 }
  0xf6   : > { %v350_v60 = vmax.f32 %v348_v42, %v349_v51  ;;  %v357_v61 = vmax.f32 %v355_v43, %v356_v52  ;;  %v364_v62 = vmax.f32 %v362_v56, %v363_v53  ;;  %v601_v63 = vrot.slane %v1826_v35, 2 }
  0xf7   : > { %v1866_v0 = vsel %vm512_vm2, %v517_v58, %v516_v50  ;;  %v602_v1 = vrot.slane %v1817_v28, 2  ;;  %v1869_v2 = vpop.f32.mrb[6].mxu0  ;;  %v1872_v3 = vsel %vm937_vm5, %v939_v26, %v938_v25  ;;  %v1875_v4 = vsel %vm1022_vm7, %v1024_v44, %v1023_v41 }
  0xf8   : > { %v351_v5 = vrot.slane %v350_v60, 1  ;;  %v358_v6 = vrot.slane %v357_v61, 2  ;;  %v365_v7 = vrot.slane %v364_v62, 4  ;;  %486 = vrot.lane.b32.xlu1 %v1817_v28, %s1733_s30  ;;  %v1879_v8 = vpop.f32.mrb[7].mxu0  ;;  %v372_v9 = vsel %vm343_vm1, %v1869_v2, -inf }
  0xf9   : > { %727 = vrot.lane.b32.xlu0 %v685_v36, %s1733_s30  ;;  %v1885_v10 = vsel %vm597_vm3, %v601_v63, %v602_v1  ;;  %v371_v11 = vsel %vm343_vm1, %v1879_v8, -inf  ;;  %v1890_v12 = vsel %vm597_vm3, %v602_v1, %v601_v63  ;;  %v686_v13 = vrot.slane %v1826_v35, 3 }
  0xfa   : > { %v352_v15 = vmax.f32 %v350_v60, %v351_v5  ;;  %v359_v17 = vmax.f32 %v357_v61, %v358_v6  ;;  %v366_v18 = vmax.f32 %v364_v62, %v365_v7  ;;  %v373_v19 = vmax.f32 %v371_v11, %v372_v9 }
  0xfb   : > { %v687_v20 = vrot.slane %v1817_v28, 3  ;;  %v1895_v21 = vsel %vm512_vm2, %v516_v50, %v517_v58  ;;  %v771_v22 = vrot.slane %v1826_v35, 4  ;;  %v772_v23 = vrot.slane %v1817_v28, 4 }
  0xfc   : > { %v380_v24 = vsub.f32 %v1802_v16, %v352_v15  ;;  %v381_v25 = vsub.f32 %v1796_v14, %v352_v15  ;;  %v360_v26 = vrot.slane %v359_v17, 1  ;;  %v367_v27 = vrot.slane %v366_v18, 2  ;;  %729 = vrot.lane.b32.xlu1 %v703_v37, %s1733_s30 }
  0xfd   : > { %982 = vrot.lane.b32.xlu0 %v940_v39, %s1733_s30  ;;  %v374_v29 = vrot.slane %v373_v19, 4  ;;  %v1904_v30 = vsel %vm682_vm4, %v686_v13, %v687_v20  ;;  %v1907_v31 = vsel %vm767_vm6, %v771_v22, %v772_v23  ;;  %v1910_v32 = vsel %vm682_vm4, %v687_v20, %v686_v13 }
  0xfe   : > { %v388_v33 = vmul.f32 1.442695, %v380_v24  ;;  %v390_v16 = vmul.f32 1.442695, %v381_v25  ;;  %v361_v34 = vmax.f32 %v359_v17, %v360_v26  ;;  %v368_v14 = vmax.f32 %v366_v18, %v367_v27 }
  0xff   : > { %v375_v36 = vmax.f32 %v373_v19, %v374_v29  ;;  %v856_v38 = vrot.slane %v1826_v35, 5  ;;  %v857_v37 = vrot.slane %v1817_v28, 5  ;;  %v1915_v39 = vsel %vm767_vm6, %v772_v23, %v771_v22 }
 0x100   : > { %1701 = vpow2.f32 %v388_v33  ;;  %v382_v40 = vsub.f32 %v1826_v35, %v361_v34  ;;  %v383_v41 = vsub.f32 %v1817_v28, %v361_v34  ;;  %v369_v42 = vrot.slane %v368_v14, 1  ;;  %812 = vrot.lane.b32.xlu1 %v1841_v47, %s1733_s30 }
 0x101   : > { %1703 = vpow2.f32 %v390_v16  ;;  %1067 = vrot.lane.b32.xlu0 %v1025_v55, %s1733_s30  ;;  %v376_v43 = vrot.slane %v375_v36, 2  ;;  %v1923_v44 = vsel %vm852_vm8, %v856_v38, %v857_v37  ;;  %v941_v45 = vrot.slane %v1826_v35, 6 }
 0x102   : > { %v392_v49 = vmul.f32 1.442695, %v382_v40  ;;  %v394_v50 = vmul.f32 1.442695, %v383_v41  ;;  %v370_v51 = vmax.f32 %v368_v14, %v369_v42  ;;  %v942_v52 = vrot.slane %v1817_v28, 6 }
 0x103   : > { %v377_v53 = vmax.f32 %v375_v36, %v376_v43  ;;  %v1928_v56 = vsel %vm852_vm8, %v857_v37, %v856_v38  ;;  %v1026_v47 = vrot.slane %v1826_v35, 7  ;;  %v1027_v58 = vrot.slane %v1817_v28, 7 }
 0x104   : > { %1705 = vpow2.f32 %v392_v49  ;;  %v384_v55 = vsub.f32 %v1851_v54, %v370_v51  ;;  %v385_v60 = vsub.f32 %v1838_v46, %v370_v51  ;;  %814 = vrot.lane.b32.xlu1 %v1844_v48, %s1733_s30  ;;  %v1937_v61 = vsel %vm937_vm5, %v942_v52, %v941_v45 }
 0x105   : > { %1707 = vpow2.f32 %v394_v50  ;;  %484 = vrot.lane.b32.xlu0 %v1826_v35, %s1733_s30  ;;  %v378_v62 = vrot.slane %v377_v53, 1  ;;  %v1942_v63 = vsel %vm1022_vm7, %v1027_v58, %v1026_v47  ;;  %v1945_v28 = vsel %vm937_vm5, %v941_v45, %v942_v52 }
 0x106   : > { %v396_v1 = vmul.f32 1.442695, %v384_v55  ;;  %v398_v5 = vmul.f32 1.442695, %v385_v60  ;;  %v519_v6 = vrot.slane %v1851_v54, 1  ;;  %v520_v48 = vrot.slane %v1838_v46, 1 }
 0x107   : > { %v379_v7 = vmax.f32 %v377_v53, %v378_v62  ;;  %v1950_v9 = vsel %vm1022_vm7, %v1026_v47, %v1027_v58  ;;  %v604_v11 = vrot.slane %v1851_v54, 2  ;;  %v605_v35 = vrot.slane %v1838_v46, 2 }
 0x108   : > { %1709 = vpow2.f32 %v396_v1  ;;  %897 = vrot.lane.b32.xlu1 %v1858_v57, %s1733_s30  ;;  %v1957_v13 = vsel %vm512_vm2, %v519_v6, %v520_v48  ;;  %v1960_v15 = vsel %vm512_vm2, %v520_v48, %v519_v6  ;;  %v689_v17 = vrot.slane %v1851_v54, 3 }
 0x109   : > { %1711 = vpow2.f32 %v398_v5  ;;  %563 = vrot.lane.b32.xlu0 %v1866_v0, %s1733_s30  ;;  %v386_v18 = vsub.f32 %v1879_v8, %v379_v7  ;;  %v387_v19 = vsub.f32 %v1869_v2, %v379_v7  ;;  %v1968_v20 = vsel %vm597_vm3, %v605_v35, %v604_v11 }
 0x10a   : > { %v1970_v57 = vpop.eup %1701  ;;  %v1973_v22 = vsel %vm597_vm3, %v604_v11, %v605_v35  ;;  %v690_v23 = vrot.slane %v1838_v46, 3  ;;  %v774_v24 = vrot.slane %v1851_v54, 4  ;;  %v775_v25 = vrot.slane %v1838_v46, 4 }
 0x10b   : > { %v1978_v26 = vpop.eup %1703  ;;  %v404_v0 = vsel %vm343_vm1, %v1970_v57, 0.0  ;;  %v400_v27 = vmul.f32 1.442695, %v386_v18  ;;  %v402_v29 = vmul.f32 1.442695, %v387_v19  ;;  %v859_v33 = vrot.slane %v1851_v54, 5 }
 0x10c   : > { %v405_v16 = vsel %vm343_vm1, %v1978_v26, 0.0  ;;  %899 = vrot.lane.b32.xlu1 %v1862_v59, %s1733_s30  ;;  %v1988_v34 = vsel %vm682_vm4, %v689_v17, %v690_v23  ;;  %v1991_v14 = vsel %vm682_vm4, %v690_v23, %v689_v17  ;;  %v1994_v36 = vsel %vm767_vm6, %v775_v25, %v774_v24 }
 0x10d   : > { %v406_v38 = vadd.f32 %v405_v16, %v404_v0  ;;  %646 = vrot.lane.b32.xlu0 %v1885_v10, %s1733_s30  ;;  %1713 = vpow2.f32 %v400_v27  ;;  %v1999_v37 = vsel %vm767_vm6, %v774_v24, %v775_v25  ;;  %v860_v40 = vrot.slane %v1838_v46, 5 }
 0x10e   : > { %v2002_v59 = vpop.eup %1705  ;;  %1715 = vpow2.f32 %v402_v29  ;;  %v944_v41 = vrot.slane %v1851_v54, 6  ;;  %v945_v42 = vrot.slane %v1838_v46, 6  ;;  %v522_v43 = vrot.slane %v1879_v8, 1 }
 0x10f   : > { %v2007_v45 = vpop.eup %1707  ;;  %v407_v49 = vrot.slane %v406_v38, 4  ;;  %v413_v10 = vsel %vm343_vm1, %v2002_v59, 0.0  ;;  %v2012_v50 = vsel %vm852_vm8, %v860_v40, %v859_v33  ;;  %v2015_v51 = vsel %vm852_vm8, %v859_v33, %v860_v40 }
 0x110   : > { %v414_v52 = vsel %vm343_vm1, %v2007_v45, 0.0  ;;  %984 = vrot.lane.b32.xlu1 %v1872_v3, %s1733_s30  ;;  %v2022_v53 = vsel %vm937_vm5, %v944_v41, %v945_v42  ;;  %v523_v47 = vrot.slane %v1869_v2, 1  ;;  %v2026_v58 = vsel %vm937_vm5, %v945_v42, %v944_v41 }
 0x111   : > { %v408_v55 = vadd.f32 %v407_v49, %v406_v38  ;;  %v415_v60 = vadd.f32 %v414_v52, %v413_v10  ;;  %648 = vrot.lane.b32.xlu0 %v1890_v12, %s1733_s30  ;;  %v607_v62 = vrot.slane %v1879_v8, 2  ;;  %v608_v1 = vrot.slane %v1869_v2, 2 }
 0x112   : > { %v2032_v5 = vpop.eup %1709  ;;  %v2035_v3 = vsel %vm512_vm2, %v523_v47, %v522_v43  ;;  %v1029_v6 = vrot.slane %v1851_v54, 7  ;;  %v1030_v48 = vrot.slane %v1838_v46, 7  ;;  %v692_v7 = vrot.slane %v1879_v8, 3 }
 0x113   : > { %v2040_v11 = vpop.eup %1711  ;;  %v409_v35 = vrot.slane %v408_v55, 2  ;;  %v416_v17 = vrot.slane %v415_v60, 4  ;;  %v422_v12 = vsel %vm343_vm1, %v2032_v5, 0.0  ;;  %v2045_v18 = vsel %vm597_vm3, %v607_v62, %v608_v1 }
 0x114   : > { %v423_v19 = vsel %vm343_vm1, %v2040_v11, 0.0  ;;  %1069 = vrot.lane.b32.xlu1 %v1875_v4, %s1733_s30  ;;  %v2052_v23 = vsel %vm1022_vm7, %v1029_v6, %v1030_v48  ;;  %v693_v24 = vrot.slane %v1869_v2, 3  ;;  %v2056_v25 = vsel %vm1022_vm7, %v1030_v48, %v1029_v6 }
 0x115   : > { %v410_v0 = vadd.f32 %v409_v35, %v408_v55  ;;  %v417_v27 = vadd.f32 %v416_v17, %v415_v60  ;;  %v424_v29 = vadd.f32 %v423_v19, %v422_v12  ;;  %731 = vrot.lane.b32.xlu0 %v1904_v30, %s1733_s30  ;;  %v777_v33 = vrot.slane %v1879_v8, 4 }
 0x116   : > { %v2062_v16 = vsel %vm682_vm4, %v692_v7, %v693_v24  ;;  %v778_v4 = vrot.slane %v1869_v2, 4  ;;  %v2066_v38 = vsel %vm512_vm2, %v522_v43, %v523_v47  ;;  %v2069_v40 = vsel %vm597_vm3, %v608_v1, %v607_v62 }
 0x117   : > { %v2071_v41 = vpop.eup %1713  ;;  %v411_v42 = vrot.slane %v410_v0, 1  ;;  %v418_v49 = vrot.slane %v417_v27, 2  ;;  %v425_v10 = vrot.slane %v424_v29, 4  ;;  %v862_v30 = vrot.slane %v1879_v8, 5 }
 0x118   : > { %v2074_v52 = vpop.eup %1715  ;;  %v431_v55 = vsel %vm343_vm1, %v2071_v41, 0.0  ;;  %561 = vrot.lane.b32.xlu1 %v1895_v21, %s1733_s30  ;;  %v2081_v43 = vsel %vm767_vm6, %v777_v33, %v778_v4  ;;  %v2084_v47 = vsel %vm767_vm6, %v778_v4, %v777_v33  ;;  %v863_v60 = vrot.slane %v1869_v2, 5 }
 0x119   : > { %v419_v62 = vadd.f32 %v418_v49, %v417_v27  ;;  %v426_v1 = vadd.f32 %v425_v10, %v424_v29  ;;  %v432_v6 = vsel %vm343_vm1, %v2074_v52, 0.0  ;;  %490 = vrot.lane.b32.xlu0 %v1838_v46, %s1733_s30  ;;  %v412_v48 = vadd.f32 %v411_v42, %v410_v0 }
 0x11a   : > { %v433_v35 = vadd.f32 %v432_v6, %v431_v55  ;;  %v2092_v21 = vsel %vm852_vm8, %v862_v30, %v863_v60  ;;  %v2095_v17 = vsel %vm682_vm4, %v693_v24, %v692_v7  ;;  %v2098_v12 = vsel %vm852_vm8, %v863_v60, %v862_v30 }
 0x11b   : > { %v420_v19 = vrot.slane %v419_v62, 1  ;;  %v427_v27 = vrot.slane %v426_v1, 2  ;;  %v440_v29 = vmul.f32 16.0, %v412_v48  ;;  %v947_v33 = vrot.slane %v1879_v8, 6 }
 0x11c   : > { %v434_v4 = vrot.slane %v433_v35, 4  ;;  %816 = vrot.lane.b32.xlu1 %v1907_v31, %s1733_s30  ;;  %v948_v46 = vrot.slane %v1869_v2, 6  ;;  %v1032_v0 = vrot.slane %v1879_v8, 7  ;;  %v1033_v42 = vrot.slane %v1869_v2, 7 }
 0x11d   : > { %v428_v7 = vadd.f32 %v427_v27, %v426_v1  ;;  %733 = vrot.lane.b32.xlu0 %v1910_v32, %s1733_s30  ;;  %1717 = vrcp.f32 %v440_v29  ;;  %v421_v24 = vadd.f32 %v420_v19, %v419_v62 }
 0x11e   : > { %v435_v49 = vadd.f32 %v434_v4, %v433_v35  ;;  %v2109_v10 = vsel %vm937_vm5, %v948_v46, %v947_v33  ;;  %v2112_v30 = vsel %vm937_vm5, %v947_v33, %v948_v46  ;;  %v2115_v31 = vsel %vm1022_vm7, %v1033_v42, %v1032_v0 }
 0x11f   : > { %v429_v55 = vrot.slane %v428_v7, 1  ;;  %v2118_v60 = vsel %vm1022_vm7, %v1032_v0, %v1033_v42  ;;  %v441_v1 = vmul.f32 16.0, %v421_v24 }
 0x120   : > { %v436_v6 = vrot.slane %v435_v49, 2  ;;  %901 = vrot.lane.b32.xlu1 %v1923_v44, %s1733_s30  ;;  %v456_v44 = vlaneseq }
 0x121   : > { %818 = vrot.lane.b32.xlu0 %v1915_v39, %s1733_s30  ;;  %1719 = vrcp.f32 %v441_v1  ;;  %v430_v32 = vadd.f32 %v429_v55, %v428_v7 }
 0x122   : > { %v437_v62 = vadd.f32 %v436_v6, %v435_v49 }
 0x123   : > { %v442_v48 = vmul.f32 16.0, %v430_v32 }
 0x124   : > { %v438_v35 = vrot.slane %v437_v62, 1  ;;  %988 = vrot.lane.b32.xlu1 %v1937_v61, %s1733_s30 }
 0x125   : > { %903 = vrot.lane.b32.xlu0 %v1928_v56, %s1733_s30  ;;  %1721 = vrcp.f32 %v442_v48  ;;  %v457_v56 = vshrl.u32 %v456_v44, 7 }
 0x126   : > { %v439_v19 = vadd.f32 %v438_v35, %v437_v62 }
 0x127   : > { %v1718_v27 = vpop.eup %1717  ;;  %v2160_v46 = vsub.s32 3, %v457_v56  ;;  %v2164_v0 = vsub.s32 4, %v457_v56  ;;  %v2169_v42 = vsub.s32 7, %v457_v56 }
 0x128   : > { %v443_v29 = vmul.f32 16.0, %v439_v19  ;;  %1073 = vrot.lane.b32.xlu1 %v1942_v63, %s1733_s30  ;;  %v2131_v39 = vmul.f32 %v1718_v27, %v1970_v57  ;;  %v2134_v33 = vmul.f32 %v1718_v27, %v1978_v26 }
 0x129   : > { %986 = vrot.lane.b32.xlu0 %v1945_v28, %s1733_s30  ;;  %v2150_v28 = vsub.s32 0, %v457_v56 }
 0x12a   : > { %1723 = vrcp.f32 %v443_v29 }
 0x12b   : > { %v1720_v61 = vpop.eup %1719 }
 0x12c   : > { %565 = vrot.lane.b32.xlu1 %v1957_v13, %s1733_s30  ;;  %v2141_v4 = vmul.f32 %v1720_v61, %v2002_v59  ;;  %v2144_v63 = vmul.f32 %v1720_v61, %v2007_v45  ;;  %v2155_v13 = vsub.s32 1, %v457_v56  ;;  %v2157_v59 = vsub.s32 2, %v457_v56 }
 0x12d   : > { %1071 = vrot.lane.b32.xlu0 %v1950_v9, %s1733_s30  ;;  %v2162_v9 = vsub.s32 6, %v457_v56 }
 0x12f   : > { %v1722_v57 = vpop.eup %1721 }
 0x130   : > { %567 = vrot.lane.b32.xlu1 %v1960_v15, %s1733_s30  ;;  %v452_v26 = vmul.f32 %v1722_v57, %v2032_v5  ;;  %v453_v45 = vmul.f32 %v1722_v57, %v2040_v11  ;;  %v2171_v5 = vsub.s32 5, %v457_v56 }
 0x131   : > { %488 = vrot.lane.b32.xlu0 %v1851_v54, %s1733_s30 }
 0x132   : > { %v2167_v15 = vrot.slane %v452_v26, %v2150_v28  ;;  %v2174_v54 = vrot.slane %v453_v45, %v2150_v28  ;;  %v2177_v7 = vrot.slane %v452_v26, %v2155_v13  ;;  %v2182_v24 = vrot.slane %v453_v45, %v2155_v13 }
 0x133   : > { %v2185_v49 = vrot.slane %v452_v26, %v2157_v59  ;;  %v2188_v55 = vrot.slane %v453_v45, %v2157_v59  ;;  %v2191_v1 = vrot.slane %v452_v26, %v2160_v46  ;;  %v2201_v62 = vrot.slane %v452_v26, %v2164_v0 }
 0x134   : > { %2690 = vst [vmem:[#allocation2_spill] sm:$0xff] %v2174_v54  ;;  %v1724_v11 = vpop.eup %1723  ;;  %652 = vrot.lane.b32.xlu1 %v1968_v20, %s1733_s30  ;;  %2691 = vst [vmem:[#allocation3_spill] sm:$0xff] %v2182_v24  ;;  %v2198_v20 = vrot.slane %v453_v45, %v2160_v46  ;;  %v2204_v48 = vrot.slane %v453_v45, %v2164_v0  ;;  %v2207_v35 = vrot.slane %v452_v26, %v2171_v5 }
 0x135   : > { %2692 = vst [vmem:[#allocation4_spill] sm:$0xff] %v2188_v55  ;;  %650 = vrot.lane.b32.xlu0 %v1973_v22, %s1733_s30  ;;  %v454_v6 = vmul.f32 %v1724_v11, %v2071_v41  ;;  %v455_v32 = vmul.f32 %v1724_v11, %v2074_v52  ;;  %v2210_v19 = vrot.slane %v453_v45, %v2171_v5 }
 0x136   : > { %2693 = vst [vmem:[#allocation5_spill] sm:$0xff] %v2198_v20  ;;  %2694 = vst [vmem:[#allocation6_spill] sm:$0xff] %v2204_v48  ;;  %v2213_v22 = vrot.slane %v452_v26, %v2162_v9  ;;  %v2222_v27 = vrot.slane %v453_v45, %v2162_v9  ;;  %v2239_v57 = vrot.slane %v452_v26, %v2169_v42 }
 0x137   : > { %2695 = vst [vmem:[#allocation7_spill] sm:$0xff] %v2210_v19  ;;  %v2216_v41 = vrot.slane %v454_v6, %v2150_v28  ;;  %v2219_v52 = vrot.slane %v455_v32, %v2150_v28  ;;  %v2225_v29 = vrot.slane %v454_v6, %v2155_v13  ;;  %v2230_v44 = vrot.slane %v455_v32, %v2155_v13 }
 0x138   : > { %2697 = vst [vmem:[#allocation9_spill] sm:$0xff] %v2222_v27  ;;  %494 = vrot.lane.b32.xlu1 %v1869_v2, %s1733_s30  ;;  %v2233_v61 = vrot.slane %v454_v6, %v2157_v59  ;;  %v2236_v56 = vrot.slane %v455_v32, %v2157_v59  ;;  %v2244_v11 = vrot.slane %v453_v45, %v2169_v42 }
 0x139   : > { %2696 = vst [vmem:[#allocation8_spill] sm:$0xff] %v2219_v52  ;;  %2698 = vst [vmem:[#allocation10_spill] sm:$0xff] %v2230_v44  ;;  %735 = vrot.lane.b32.xlu0 %v1988_v34, %s1733_s30  ;;  %v2247_v2 = vrot.slane %v454_v6, %v2160_v46  ;;  %v2250_v44 = vrot.slane %v455_v32, %v2160_v46  ;;  %v2253_v52 = vrot.slane %v454_v6, %v2164_v0 }
 0x13a   : > { %2699 = vst [vmem:[#allocation11_spill] sm:$0xff] %v2233_v61  ;;  %2700 = vst [vmem:[#allocation12_spill] sm:$0xff] %v2236_v56  ;;  %v2256_v56 = vrot.slane %v455_v32, %v2164_v0  ;;  %v2259_v26 = vrot.slane %v454_v6, %v2171_v5  ;;  %v2262_v34 = vrot.slane %v455_v32, %v2171_v5 }
 0x13b   : > { %2701 = vst [vmem:[#allocation13_spill] sm:$0xff] %v2244_v11  ;;  %2702 = vst [vmem:[#allocation14_spill] sm:$0xff] %v2247_v2  ;;  %v2265_v45 = vrot.slane %v454_v6, %v2162_v9  ;;  %v2268_v11 = vrot.slane %v455_v32, %v2162_v9  ;;  %v1110_v2 = vrot.slane %v2134_v33, %v2150_v28 }
 0x13c   : > { %2703 = vst [vmem:[#allocation15_spill] sm:$0xff] %v2250_v44  ;;  %2704 = vst [vmem:[#allocation16_spill] sm:$0xff] %v2253_v52  ;;  %v2271_v44 = vrot.slane %v454_v6, %v2169_v42  ;;  %v2274_v52 = vrot.slane %v455_v32, %v2169_v42  ;;  %737 = vrot.lane.b32.xlu1 %v1991_v14, %s1733_s30  ;;  %v1142_v48 = vrot.slane %v2134_v33, %v2155_v13 }
 0x13d   : > { %2705 = vst [vmem:[#allocation17_spill] sm:$0xff] %v2256_v56  ;;  %2706 = vst [vmem:[#allocation18_spill] sm:$0xff] %v2259_v26  ;;  %822 = vrot.lane.b32.xlu0 %v1994_v36, %s1733_s30  ;;  %v965_v56 = vrot.slane %v2131_v39, %v2162_v9 }
 0x13e   : > { %2707 = vst [vmem:[#allocation19_spill] sm:$0xff] %v2262_v34  ;;  %2708 = vst [vmem:[#allocation20_spill] sm:$0xff] %v2265_v45  ;;  %v880_v34 = vrot.slane %v2131_v39, %v2171_v5 }
 0x13f   : > { %2709 = vst [vmem:[#allocation21_spill] sm:$0xff] %v2268_v11  ;;  %2710 = vst [vmem:[#allocation22_spill] sm:$0xff] %v2271_v44 }
 0x140   : > { %2711 = vst [vmem:[#allocation23_spill] sm:$0xff] %v2274_v52  ;;  %820 = vrot.lane.b32.xlu1 %v1999_v37, %s1733_s30 }
 0x141   : > { %907 = vrot.lane.b32.xlu0 %v2012_v50, %s1733_s30 }
 0x144   : > { %905 = vrot.lane.b32.xlu1 %v2015_v51, %s1733_s30 }
 0x145   : > { %492 = vrot.lane.b32.xlu0 %v1879_v8, %s1733_s30 }
 0x148   : > { %990 = vrot.lane.b32.xlu1 %v2022_v53, %s1733_s30 }
 0x149   : > { %571 = vrot.lane.b32.xlu0 %v2035_v3, %s1733_s30 }
 0x14c   : > { %992 = vrot.lane.b32.xlu1 %v2026_v58, %s1733_s30 }
 0x14d   : > { %654 = vrot.lane.b32.xlu0 %v2045_v18, %s1733_s30  ;;  %v540_v18 = vrot.slane %v2131_v39, %v2155_v13 }
 0x150   : > { %1075 = vrot.lane.b32.xlu1 %v2052_v23, %s1733_s30 }
 0x151   : > { %739 = vrot.lane.b32.xlu0 %v2062_v16, %s1733_s30 }
 0x154   : > { %1077 = vrot.lane.b32.xlu1 %v2056_v25, %s1733_s30  ;;  %v459_v25 = vrot.slane %v2131_v39, %v2150_v28 }
 0x155   : > { %824 = vrot.lane.b32.xlu0 %v2081_v43, %s1733_s30 }
 0x158   : > { %569 = vrot.lane.b32.xlu1 %v2066_v38, %s1733_s30  ;;  %v625_v38 = vrot.slane %v2131_v39, %v2157_v59 }
 0x159   : > { %826 = vrot.lane.b32.xlu0 %v2084_v47, %s1733_s30 }
 0x15c   : > { %656 = vrot.lane.b32.xlu1 %v2069_v40, %s1733_s30 }
 0x15d   : > { %909 = vrot.lane.b32.xlu0 %v2092_v21, %s1733_s30  ;;  %v710_v21 = vrot.slane %v2131_v39, %v2160_v46 }
 0x15e   : > { %v483_v8 = vpop.permute.xlu1 %482 }
 0x15f   : > { %v2312_v14 = vpop.permute.xlu0 %480 }
 0x160   : > { %741 = vrot.lane.b32.xlu1 %v2095_v17, %s1733_s30  ;;  %v504_v43 = vmul.f32 %v2312_v14, %v459_v25 }
 0x161   : > { %911 = vrot.lane.b32.xlu0 %v2098_v12, %s1733_s30 }
 0x162   : > { %v560_v36 = vpop.permute.xlu1 %559 }
 0x163   : > { %v2318_v37 = vpop.permute.xlu0 %557  ;;  %v582_v52 = vmul.f32 %v560_v36, %v540_v18  ;;  %v1155_v20 = vmul.f32 %v1142_v48, %v560_v36 }
 0x164   : > { %996 = vrot.lane.b32.xlu1 %v2109_v10, %s1733_s30  ;;  %v581_v16 = vmul.f32 %v2318_v37, %v540_v18 }
 0x165   : > { %994 = vrot.lane.b32.xlu0 %v2112_v30, %s1733_s30  ;;  %v795_v30 = vrot.slane %v2131_v39, %v2164_v0 }
 0x166   : > { %v645_v50 = vpop.permute.xlu1 %644  ;;  %v589_v12 = vadd.f32 %v581_v16, %v504_v43  ;;  %v505_v43 = vmul.f32 %v483_v8, %v459_v25 }
 0x167   : > { %v2324_v51 = vpop.permute.xlu0 %642  ;;  %v667_v44 = vmul.f32 %v645_v50, %v625_v38 }
 0x168   : > { %1081 = vrot.lane.b32.xlu1 %v2115_v31, %s1733_s30  ;;  %v666_v47 = vmul.f32 %v2324_v51, %v625_v38  ;;  %v590_v18 = vadd.f32 %v582_v52, %v505_v43 }
 0x169   : > { %1079 = vrot.lane.b32.xlu0 %v2118_v60, %s1733_s30 }
 0x16a   : > { %v2330_v53 = vpop.permute.xlu1 %486  ;;  %v674_v60 = vadd.f32 %v666_v47, %v589_v12  ;;  %v1050_v12 = vrot.slane %v2131_v39, %v2169_v42  ;;  %v675_v61 = vadd.f32 %v667_v44, %v590_v18  ;;  %v1123_v39 = vmul.f32 %v1110_v2, %v483_v8 }
 0x16b   : > { %v2332_v58 = vpop.permute.xlu0 %727 }
 0x16c   : > { %v751_v10 = vmul.f32 %v2332_v58, %v710_v21 }
 0x16e   : > { %v730_v3 = vpop.permute.xlu1 %729  ;;  %v759_v11 = vadd.f32 %v751_v10, %v674_v60 }
 0x16f   : > { %v2336_v23 = vpop.permute.xlu0 %982  ;;  %v752_v10 = vmul.f32 %v730_v3, %v710_v21 }
 0x170   : > { %v1006_v60 = vmul.f32 %v2336_v23, %v965_v56 }
 0x171   : > { %v760_v52 = vadd.f32 %v752_v10, %v675_v61  ;;  %v1363_v61 = vld [vmem:[%s2665_s2] sm:$0xff] }
 0x172   : > { %v2343_v40 = vpop.permute.xlu1 %812 }
 0x173   : > { %v2349_v17 = vpop.permute.xlu0 %1067  ;;  %v836_v6 = vmul.f32 %v2343_v40, %v795_v30 }
 0x174   : > { %v1091_v25 = vmul.f32 %v2349_v17, %v1050_v12 }
 0x175   : > { %v844_v45 = vadd.f32 %v836_v6, %v759_v11 }
 0x176   : > { %v815_v31 = vpop.permute.xlu1 %814 }
 0x177   : > { %v2355_v32 = vpop.permute.xlu0 %484  ;;  %v837_v11 = vmul.f32 %v815_v31, %v795_v30 }
 0x179   : > { %v845_v55 = vadd.f32 %v837_v11, %v760_v52  ;;  %v544_v52 = vrot.slane %v2141_v4, %v2155_v13 }
 0x17a   : > { %v2361_v16 = vpop.permute.xlu1 %897 }
 0x17b   : > { %v921_v26 = vmul.f32 %v2361_v16, %v880_v34  ;;  %v2364_v47 = vpop.permute.xlu0 %563 }
 0x17d   : > { %v929_v27 = vadd.f32 %v921_v26, %v844_v45  ;;  %v1174_v26 = vrot.slane %v2134_v33, %v2157_v59 }
 0x17e   : > { %v900_v19 = vpop.permute.xlu1 %899 }
 0x17f   : > { %v1014_v38 = vadd.f32 %v1006_v60, %v929_v27  ;;  %v2372_v6 = vpop.permute.xlu0 %646  ;;  %v922_v43 = vmul.f32 %v900_v19, %v880_v34  ;;  %v1206_v27 = vrot.slane %v2134_v33, %v2160_v46  ;;  %v1187_v30 = vmul.f32 %v1174_v26, %v645_v50  ;;  %v1364_v34 = vld [vmem:[%s2665_s2 + $0x8] sm:$0xff]  ;;  %v1365_v50 = vld [vmem:[%s2665_s2 + $0x10] sm:$0xff] }
 0x180   : > { %v1683_v10 = vpack.c.bf16 %v1364_v34, %v1363_v61 }
 0x181   : > { %v1099_v21 = vadd.f32 %v1091_v25, %v1014_v38  ;;  %v930_v54 = vadd.f32 %v922_v43, %v845_v55  ;;  %v1219_v8 = vmul.f32 %v1206_v27, %v730_v3  ;;  %v1366_v55 = vld [vmem:[%s2665_s2 + $0x18] sm:$0xff]  ;;  %v1270_v3 = vrot.slane %v2134_v33, %v2171_v5 }
 0x182   : > { %v985_v45 = vpop.permute.xlu1 %984  ;;  %1684 = vmatprep.subr.bf16.mxu1 %v1683_v10 }
 0x183   : > { %v1131_v44 = vadd.f32 %v1123_v39, %v1099_v21  ;;  %v1007_v18 = vmul.f32 %v985_v45, %v965_v56  ;;  %v2378_v24 = vpop.permute.xlu0 %648  ;;  %v1238_v56 = vrot.slane %v2134_v33, %v2164_v0  ;;  %v1687_v39 = vpack.c.bf16 %v1366_v55, %v1365_v50  ;;  %1686 = vmatpush3.bf16.msra.mxu1 %v1683_v10 }
 0x184   : > { %v1124_v21 = vmul.f32 %v1110_v2, %v2312_v14  ;;  %v1283_v34 = vmul.f32 %v1270_v3, %v900_v19  ;;  %v629_v19 = vrot.slane %v2141_v4, %v2157_v59 }
 0x185   : > { %v1163_v60 = vadd.f32 %v1155_v20, %v1131_v44  ;;  %v1015_v25 = vadd.f32 %v1007_v18, %v930_v54  ;;  %v1251_v43 = vmul.f32 %v1238_v56, %v815_v31  ;;  %v463_v54 = vrot.slane %v2141_v4, %v2150_v28  ;;  %1688 = vmatprep.subr.bf16.mxu1 %v1687_v39 }
 0x186   : > { %v1070_v36 = vpop.permute.xlu1 %1069  ;;  %v1334_v31 = vrot.slane %v2134_v33, %v2169_v42 }
 0x187   : > { %v1195_v20 = vadd.f32 %v1187_v30, %v1163_v60  ;;  %v1092_v11 = vmul.f32 %v1070_v36, %v1050_v12  ;;  %v2396_v38 = vpop.permute.xlu0 %731  ;;  %v1156_v30 = vmul.f32 %v1142_v48, %v2318_v37  ;;  %v1302_v12 = vrot.slane %v2134_v33, %v2162_v9  ;;  %1690 = vmatpush3.bf16.msra.mxu1 %v1687_v39 }
 0x188   : > { %v506_v48 = vmul.f32 %v2355_v32, %v463_v54  ;;  %v1188_v37 = vmul.f32 %v1174_v26, %v2324_v51  ;;  %v507_v51 = vmul.f32 %v2330_v53, %v463_v54  ;;  %v668_v26 = vmul.f32 %v2372_v6, %v629_v19 }
 0x189   : > { %v1227_v44 = vadd.f32 %v1219_v8, %v1195_v20  ;;  %v1100_v61 = vadd.f32 %v1092_v11, %v1015_v25  ;;  %v1315_v10 = vmul.f32 %v1302_v12, %v985_v45  ;;  %v584_v20 = vmul.f32 %v2364_v47, %v544_v52 }
 0x18a   : > { %v2408_v18 = vpop.permute.xlu1 %561  ;;  %v669_v45 = vmul.f32 %v2378_v24, %v629_v19  ;;  %v714_v39 = vrot.slane %v2141_v4, %v2160_v46  ;;  %v1284_v54 = vmul.f32 %v1270_v3, %v2361_v16  ;;  %v884_v19 = vrot.slane %v2141_v4, %v2171_v5 }
 0x18b   : > { %v1259_v60 = vadd.f32 %v1251_v43, %v1227_v44  ;;  %v1132_v50 = vadd.f32 %v1124_v21, %v1100_v61  ;;  %v583_v2 = vmul.f32 %v2408_v18, %v544_v52  ;;  %v2411_v14 = vpop.permute.xlu0 %490  ;;  %v1220_v21 = vmul.f32 %v1206_v27, %v2332_v58 }
 0x18c   : > { %v1347_v44 = vmul.f32 %v1334_v31, %v1070_v36  ;;  %v1252_v52 = vmul.f32 %v1238_v56, %v2343_v40  ;;  %v799_v27 = vrot.slane %v2141_v4, %v2164_v0  ;;  %v753_v56 = vmul.f32 %v2396_v38, %v714_v39 }
 0x18d   : > { %v1291_v8 = vadd.f32 %v1283_v34, %v1259_v60  ;;  %v1164_v55 = vadd.f32 %v1156_v30, %v1132_v50  ;;  %v591_v25 = vadd.f32 %v583_v2, %v506_v48  ;;  %v592_v34 = vadd.f32 %v584_v20, %v507_v51 }
 0x18e   : > { %v2420_v11 = vpop.permute.xlu1 %816  ;;  %v1348_v3 = vmul.f32 %v1334_v31, %v2349_v17 }
 0x18f   : > { %v1323_v43 = vadd.f32 %v1315_v10, %v1291_v8  ;;  %v1196_v33 = vadd.f32 %v1188_v37, %v1164_v55  ;;  %v2423_v61 = vpop.permute.xlu0 %733  ;;  %v676_v58 = vadd.f32 %v668_v26, %v591_v25  ;;  %v677_v40 = vadd.f32 %v669_v45, %v592_v34 }
 0x190   : > { %v754_v36 = vmul.f32 %v2423_v61, %v714_v39  ;;  %v1316_v8 = vmul.f32 %v1302_v12, %v2336_v23  ;;  %v1054_v12 = vrot.slane %v2141_v4, %v2169_v42 }
 0x191   : > { %v1228_v30 = vadd.f32 %v1220_v21, %v1196_v33  ;;  %v1355_v60 = vadd.f32 %v1347_v44, %v1323_v43  ;;  %v761_v55 = vadd.f32 %v753_v56, %v676_v58  ;;  %v838_v43 = vmul.f32 %v2420_v11, %v799_v27 }
 0x192   : > { %v2434_v50 = vpop.permute.xlu1 %901  ;;  %v762_v20 = vadd.f32 %v754_v36, %v677_v40  ;;  %v969_v44 = vrot.slane %v2141_v4, %v2162_v9  ;;  %v1178_v40 = vrot.slane %v2144_v63, %v2157_v59 }
 0x193   : > { %v2437_v2 = vpop.permute.xlu0 %818  ;;  %1382 = vrot.lane.b32.xlu0 %v1355_v60, %s1734_s13  ;;  %v1260_v48 = vadd.f32 %v1252_v52, %v1228_v30  ;;  %v846_v26 = vadd.f32 %v838_v43, %v761_v55  ;;  %v923_v45 = vmul.f32 %v2434_v50, %v884_v19  ;;  %v1114_v60 = vrot.slane %v2144_v63, %v2150_v28 }
 0x194   : > { %v839_v37 = vmul.f32 %v2437_v2, %v799_v27  ;;  %v1146_v27 = vrot.slane %v2144_v63, %v2155_v13  ;;  %v1210_v55 = vrot.slane %v2144_v63, %v2160_v46  ;;  %v509_v43 = vmul.f32 %v2411_v14, %v2167_v15 }
 0x195   : > { %v1292_v10 = vadd.f32 %v1284_v54, %v1260_v48  ;;  %v1126_v4 = vmul.f32 %v1114_v60, %v2355_v32  ;;  %v931_v36 = vadd.f32 %v923_v45, %v846_v26  ;;  %v1242_v32 = vrot.slane %v2144_v63, %v2164_v0 }
 0x196   : > { %v2445_v16 = vpop.permute.xlu1 %988  ;;  %v847_v33 = vadd.f32 %v839_v37, %v762_v20  ;;  %v1158_v37 = vmul.f32 %v1146_v27, %v2408_v18  ;;  %v1125_v13 = vmul.f32 %v1114_v60, %v2330_v53  ;;  %v1190_v20 = vmul.f32 %v1178_v40, %v2372_v6 }
 0x197   : > { %v2448_v25 = vpop.permute.xlu0 %903  ;;  %v1324_v21 = vadd.f32 %v1316_v8, %v1292_v10  ;;  %v1009_v17 = vmul.f32 %v2445_v16, %v969_v44  ;;  %v1157_v59 = vmul.f32 %v1146_v27, %v2364_v47  ;;  %v1222_v18 = vmul.f32 %v1210_v55, %v2396_v38 }
 0x198   : > { %v924_v23 = vmul.f32 %v2448_v25, %v884_v19  ;;  %v1189_v47 = vmul.f32 %v1178_v40, %v2378_v24  ;;  %v1274_v38 = vrot.slane %v2144_v63, %v2171_v5 }
 0x199   : > { %v1356_v51 = vadd.f32 %v1348_v3, %v1324_v21 }
 0x19a   : > { %v932_v31 = vadd.f32 %v924_v23, %v847_v33  ;;  %v2458_v39 = vpop.permute.xlu1 %1073  ;;  %v1286_v5 = vmul.f32 %v1274_v38, %v2434_v50  ;;  %v1285_v40 = vmul.f32 %v1274_v38, %v2448_v25 }
 0x19b   : > { %v1094_v52 = vmul.f32 %v2458_v39, %v1054_v12  ;;  %v987_v30 = vpop.permute.xlu0 %986  ;;  %1384 = vrot.lane.b32.xlu1 %v1356_v51, %s1734_s13 }
 0x19c   : > { %v1017_v34 = vadd.f32 %v1009_v17, %v932_v31  ;;  %v1008_v58 = vmul.f32 %v987_v30, %v969_v44  ;;  %v1221_v31 = vmul.f32 %v1210_v55, %v2423_v61  ;;  %v1338_v61 = vrot.slane %v2144_v63, %v2169_v42 }
 0x19e   : > { %v1102_v54 = vadd.f32 %v1094_v52, %v1017_v34  ;;  %v2467_v48 = vpop.permute.xlu1 %565  ;;  %v1016_v10 = vadd.f32 %v1008_v58, %v931_v36  ;;  %v1253_v34 = vmul.f32 %v1242_v32, %v2437_v2 }
 0x19f   : > { %v1072_v56 = vpop.permute.xlu0 %1071  ;;  %v585_v53 = vmul.f32 %v2467_v48, %v2177_v7 }
 0x1a0   : > { %v1134_v8 = vadd.f32 %v1126_v4, %v1102_v54  ;;  %v1093_v28 = vmul.f32 %v1072_v56, %v1054_v12  ;;  %v1254_v12 = vmul.f32 %v1242_v32, %v2420_v11 }
 0x1a2   : > { %v1166_v19 = vadd.f32 %v1158_v37, %v1134_v8  ;;  %v1101_v3 = vadd.f32 %v1093_v28, %v1016_v10  ;;  %v2478_v21 = vpop.permute.xlu1 %567  ;;  %v1350_v8 = vmul.f32 %v1338_v61, %v1072_v56 }
 0x1a3   : > { %v586_v46 = vmul.f32 %v2478_v21, %v2177_v7  ;;  %v2486_v33 = vpop.permute.xlu0 %488  ;;  %v1306_v7 = vrot.slane %v2144_v63, %v2162_v9 }
 0x1a4   : > { %v1198_v0 = vadd.f32 %v1190_v20, %v1166_v19  ;;  %v1133_v6 = vadd.f32 %v1125_v13, %v1101_v3  ;;  %v508_v44 = vmul.f32 %v2486_v33, %v2167_v15  ;;  %v1349_v13 = vmul.f32 %v1338_v61, %v2458_v39  ;;  %v2713_v61 = vld [vmem:[#allocation3_spill] sm:$0xff] }
 0x1a5   : > { %v594_v23 = vadd.f32 %v586_v46, %v509_v43  ;;  %v1318_v9 = vmul.f32 %v1306_v7, %v987_v30  ;;  %v1317_v10 = vmul.f32 %v1306_v7, %v2445_v16 }
 0x1a6   : > { %v1230_v51 = vadd.f32 %v1222_v18, %v1198_v0  ;;  %v1165_v26 = vadd.f32 %v1157_v59, %v1133_v6  ;;  %v593_v45 = vadd.f32 %v585_v53, %v508_v44  ;;  %v2496_v17 = vpop.permute.xlu1 %652 }
 0x1a7   : > { %v671_v15 = vmul.f32 %v2496_v17, %v2185_v49  ;;  %v2503_v24 = vpop.permute.xlu0 %650 }
 0x1a8   : > { %v1262_v52 = vadd.f32 %v1254_v12, %v1230_v51  ;;  %v1197_v60 = vadd.f32 %v1189_v47, %v1165_v26  ;;  %v670_v11 = vmul.f32 %v2503_v24, %v2185_v49 }
 0x1a9   : > { %v679_v58 = vadd.f32 %v671_v15, %v594_v23 }
 0x1aa   : > { %v1294_v4 = vadd.f32 %v1286_v5, %v1262_v52  ;;  %v1229_v27 = vadd.f32 %v1221_v31, %v1197_v60  ;;  %v678_v36 = vadd.f32 %v670_v11, %v593_v45  ;;  %v2511_v54 = vpop.permute.xlu1 %494  ;;  %v2712_v52 = vld [vmem:[#allocation2_spill] sm:$0xff] }
 0x1ab   : > { %v2514_v50 = vpop.permute.xlu0 %735  ;;  %v511_v38 = vmul.f32 %v2511_v54, %v2216_v41  ;;  %v1127_v60 = vmul.f32 %v2712_v52, %v2411_v14  ;;  %v1160_v14 = vmul.f32 %v2713_v61, %v2467_v48  ;;  %v2717_v48 = vld [vmem:[#allocation11_spill] sm:$0xff] }
 0x1ac   : > { %v1326_v37 = vadd.f32 %v1318_v9, %v1294_v4  ;;  %v755_v49 = vmul.f32 %v2514_v50, %v2191_v1  ;;  %v1261_v2 = vadd.f32 %v1253_v34, %v1229_v27  ;;  %v1128_v27 = vmul.f32 %v2712_v52, %v2486_v33 }
 0x1ae   : > { %v1358_v63 = vadd.f32 %v1350_v8, %v1326_v37  ;;  %v763_v42 = vadd.f32 %v755_v49, %v678_v36  ;;  %v738_v28 = vpop.permute.xlu1 %737  ;;  %v1293_v30 = vadd.f32 %v1285_v40, %v1261_v2  ;;  %v2714_v36 = vld [vmem:[#allocation4_spill] sm:$0xff]  ;;  %v2715_v49 = vld [vmem:[#allocation5_spill] sm:$0xff] }
 0x1af   : > { %v756_v55 = vmul.f32 %v738_v28, %v2191_v1  ;;  %v823_v32 = vpop.permute.xlu0 %822  ;;  %v1191_v40 = vmul.f32 %v2714_v36, %v2496_v17  ;;  %v1223_v2 = vmul.f32 %v2715_v49, %v738_v28  ;;  %v1192_v17 = vmul.f32 %v2714_v36, %v2503_v24 }
 0x1b0   : > { %v841_v25 = vmul.f32 %v823_v32, %v2201_v62  ;;  %1388 = vrot.lane.b32.xlu1 %v1358_v63, %s1734_s13  ;;  %v1325_v56 = vadd.f32 %v1317_v10, %v1293_v30  ;;  %v2716_v30 = vld [vmem:[#allocation6_spill] sm:$0xff] }
 0x1b1   : > { %v764_v20 = vadd.f32 %v756_v55, %v679_v58  ;;  %v1159_v58 = vmul.f32 %v2713_v61, %v2478_v21  ;;  %v1255_v55 = vmul.f32 %v2716_v30, %v823_v32  ;;  %v2723_v61 = vld [vmem:[#allocation18_spill] sm:$0xff] }
 0x1b2   : > { %v2523_v19 = vpop.permute.xlu1 %820  ;;  %v1357_v3 = vadd.f32 %v1349_v13, %v1325_v56 }
 0x1b3   : > { %v849_v59 = vadd.f32 %v841_v25, %v764_v20  ;;  %v840_v16 = vmul.f32 %v2523_v19, %v2201_v62  ;;  %v908_v18 = vpop.permute.xlu0 %907  ;;  %v2718_v20 = vld [vmem:[#allocation7_spill] sm:$0xff] }
 0x1b4   : > { %v926_v43 = vmul.f32 %v908_v18, %v2207_v35  ;;  %1386 = vrot.lane.b32.xlu0 %v1357_v3, %s1734_s13  ;;  %v1287_v3 = vmul.f32 %v2718_v20, %v908_v18  ;;  %v1256_v18 = vmul.f32 %v2716_v30, %v2523_v19 }
 0x1b5   : > { %v848_v1 = vadd.f32 %v840_v16, %v763_v42 }
 0x1b6   : > { %v934_v39 = vadd.f32 %v926_v43, %v849_v59  ;;  %v2529_v46 = vpop.permute.xlu1 %905  ;;  %v2719_v59 = vld [vmem:[#allocation14_spill] sm:$0xff] }
 0x1b7   : > { %v925_v0 = vmul.f32 %v2529_v46, %v2207_v35  ;;  %v2533_v53 = vpop.permute.xlu0 %492 }
 0x1b9   : > { %v933_v6 = vadd.f32 %v925_v0, %v848_v1  ;;  %v2720_v0 = vld [vmem:[#allocation9_spill] sm:$0xff] }
 0x1ba   : > { %v2535_v44 = vpop.permute.xlu1 %990 }
 0x1bb   : > { %v1010_v62 = vmul.f32 %v2535_v44, %v2213_v22  ;;  %v2539_v47 = vpop.permute.xlu0 %571 }
 0x1bc   : > { %v588_v23 = vmul.f32 %v2539_v47, %v2225_v29 }
 0x1bd   : > { %v1018_v12 = vadd.f32 %v1010_v62, %v933_v6  ;;  %v2721_v62 = vld [vmem:[#allocation16_spill] sm:$0xff] }
 0x1be   : > { %v596_v51 = vadd.f32 %v588_v23, %v511_v38  ;;  %v993_v26 = vpop.permute.xlu1 %992 }
 0x1bf   : > { %v1011_v35 = vmul.f32 %v993_v26, %v2213_v22  ;;  %v2546_v45 = vpop.permute.xlu0 %654  ;;  %v1319_v6 = vmul.f32 %v2720_v0, %v993_v26 }
 0x1c0   : > { %v672_v28 = vmul.f32 %v2546_v45, %v2717_v48 }
 0x1c1   : > { %v1019_v31 = vadd.f32 %v1011_v35, %v934_v39 }
 0x1c2   : > { %v2548_v7 = vpop.permute.xlu1 %1075 }
 0x1c3   : > { %v1095_v15 = vmul.f32 %v2548_v7, %v2239_v57  ;;  %v2552_v5 = vpop.permute.xlu0 %739 }
 0x1c5   : > { %v1103_v11 = vadd.f32 %v1095_v15, %v1018_v12 }
 0x1c6   : > { %v1078_v34 = vpop.permute.xlu1 %1077 }
 0x1c7   : > { %v1135_v4 = vadd.f32 %v1127_v60, %v1103_v11  ;;  %v1096_v22 = vmul.f32 %v1078_v34, %v2239_v57  ;;  %v2559_v9 = vpop.permute.xlu0 %824  ;;  %v510_v57 = vmul.f32 %v2533_v53, %v2216_v41  ;;  %v1224_v41 = vmul.f32 %v2715_v49, %v2514_v50 }
 0x1c8   : > { %v842_v38 = vmul.f32 %v2559_v9, %v2721_v62 }
 0x1c9   : > { %v1167_v37 = vadd.f32 %v1159_v58, %v1135_v4  ;;  %v1104_v8 = vadd.f32 %v1096_v22, %v1019_v31  ;;  %v2722_v31 = vld [vmem:[#allocation13_spill] sm:$0xff]  ;;  %v1288_v22 = vmul.f32 %v2718_v20, %v2529_v46 }
 0x1ca   : > { %v2568_v10 = vpop.permute.xlu1 %569  ;;  %v1351_v15 = vmul.f32 %v2722_v31, %v1078_v34  ;;  %v1320_v34 = vmul.f32 %v2720_v0, %v2535_v44  ;;  %v1352_v46 = vmul.f32 %v2722_v31, %v2548_v7  ;;  %v2728_v0 = vld [vmem:[#allocation12_spill] sm:$0xff] }
 0x1cb   : > { %v1199_v21 = vadd.f32 %v1191_v40, %v1167_v37  ;;  %v1136_v63 = vadd.f32 %v1128_v27, %v1104_v8  ;;  %v587_v33 = vmul.f32 %v2568_v10, %v2225_v29  ;;  %v2574_v42 = vpop.permute.xlu0 %826  ;;  %v757_v29 = vmul.f32 %v2552_v5, %v2719_v59 }
 0x1cd   : > { %v1231_v13 = vadd.f32 %v1223_v2, %v1199_v21  ;;  %v1168_v25 = vadd.f32 %v1160_v14, %v1136_v63  ;;  %v595_v56 = vadd.f32 %v587_v33, %v510_v57  ;;  %v2724_v57 = vld [vmem:[#allocation20_spill] sm:$0xff] }
 0x1ce   : > { %v657_v16 = vpop.permute.xlu1 %656 }
 0x1cf   : > { %v1263_v43 = vadd.f32 %v1255_v55, %v1231_v13  ;;  %v1200_v1 = vadd.f32 %v1192_v17, %v1168_v25  ;;  %v680_v24 = vadd.f32 %v672_v28, %v595_v56  ;;  %v673_v32 = vmul.f32 %v657_v16, %v2717_v48  ;;  %v910_v39 = vpop.permute.xlu0 %909  ;;  %v2725_v28 = vld [vmem:[#allocation22_spill] sm:$0xff] }
 0x1d0   : > { %v927_v58 = vmul.f32 %v910_v39, %v2723_v61 }
 0x1d1   : > { %v1295_v23 = vadd.f32 %v1287_v3, %v1263_v43  ;;  %v1232_v12 = vadd.f32 %v1224_v41, %v1200_v1  ;;  %v681_v50 = vadd.f32 %v673_v32, %v596_v51  ;;  %v765_v35 = vadd.f32 %v757_v29, %v680_v24  ;;  %v2726_v41 = vld [vmem:[#allocation8_spill] sm:$0xff]  ;;  %v2727_v29 = vld [vmem:[#allocation10_spill] sm:$0xff] }
 0x1d2   : > { %v742_v52 = vpop.permute.xlu1 %741  ;;  %v843_v51 = vmul.f32 %v2574_v42, %v2721_v62  ;;  %v1130_v7 = vmul.f32 %v2726_v41, %v2533_v53  ;;  %v1129_v3 = vmul.f32 %v2726_v41, %v2511_v54  ;;  %v1162_v43 = vmul.f32 %v2727_v29, %v2568_v10  ;;  %v2730_v10 = vld [vmem:[#allocation17_spill] sm:$0xff] }
 0x1d3   : > { %v1327_v60 = vadd.f32 %v1319_v6, %v1295_v23  ;;  %v850_v11 = vadd.f32 %v842_v38, %v765_v35  ;;  %v758_v4 = vmul.f32 %v742_v52, %v2719_v59  ;;  %v912_v26 = vpop.permute.xlu0 %911  ;;  %v1264_v27 = vadd.f32 %v1256_v18, %v1232_v12  ;;  %v2729_v23 = vld [vmem:[#allocation15_spill] sm:$0xff] }
 0x1d4   : > { %v928_v49 = vmul.f32 %v912_v26, %v2723_v61  ;;  %v1161_v24 = vmul.f32 %v2727_v29, %v2539_v47  ;;  %v1194_v6 = vmul.f32 %v2728_v0, %v2546_v45  ;;  %v1193_v38 = vmul.f32 %v2728_v0, %v657_v16  ;;  %v2731_v45 = vld [vmem:[#allocation19_spill] sm:$0xff] }
 0x1d5   : > { %v1359_v36 = vadd.f32 %v1351_v15, %v1327_v60  ;;  %v935_v40 = vadd.f32 %v927_v58, %v850_v11  ;;  %v766_v19 = vadd.f32 %v758_v4, %v681_v50  ;;  %v1296_v8 = vadd.f32 %v1288_v22, %v1264_v27  ;;  %v2732_v58 = vld [vmem:[#allocation21_spill] sm:$0xff] }
 0x1d6   : > { %v997_v37 = vpop.permute.xlu1 %996  ;;  %v1226_v12 = vmul.f32 %v2729_v23, %v2552_v5  ;;  %v1225_v50 = vmul.f32 %v2729_v23, %v742_v52  ;;  %v1258_v18 = vmul.f32 %v2730_v10, %v2559_v9  ;;  %v1257_v47 = vmul.f32 %v2730_v10, %v2574_v42 }
 0x1d7   : > { %v851_v14 = vadd.f32 %v843_v51, %v766_v19  ;;  %1390 = vrot.lane.b32.xlu0 %v1359_v36, %s1734_s13  ;;  %v995_v2 = vpop.permute.xlu0 %994  ;;  %v1328_v63 = vadd.f32 %v1320_v34, %v1296_v8  ;;  %v1013_v17 = vmul.f32 %v997_v37, %v2724_v57  ;;  %v1290_v60 = vmul.f32 %v2731_v45, %v910_v39  ;;  %v2733_v36 = vld [vmem:[#allocation23_spill] sm:$0xff] }
 0x1d8   : > { %v1012_v21 = vmul.f32 %v995_v2, %v2724_v57  ;;  %v1289_v16 = vmul.f32 %v2731_v45, %v912_v26  ;;  %v1322_v5 = vmul.f32 %v2732_v58, %v995_v2  ;;  %v1321_v52 = vmul.f32 %v2732_v58, %v997_v37 }
 0x1d9   : > { %v936_v33 = vadd.f32 %v928_v49, %v851_v14  ;;  %v1360_v44 = vadd.f32 %v1352_v46, %v1328_v63  ;;  %v1600_v46 = vld [vmem:[%s2666_s3] ss:$0 sm:$0xff] }
 0x1da   : > { %v1020_v30 = vadd.f32 %v1012_v21, %v935_v40  ;;  %v1082_v55 = vpop.permute.xlu1 %1081 }
 0x1db   : > { %v1021_v48 = vadd.f32 %v1013_v17, %v936_v33  ;;  %v1098_v13 = vmul.f32 %v1082_v55, %v2725_v28  ;;  %v1080_v25 = vpop.permute.xlu0 %1079  ;;  %1392 = vrot.lane.b32.xlu1 %v1360_v44, %s1734_s13  ;;  %v1353_v51 = vmul.f32 %v2733_v36, %v1082_v55 }
 0x1dc   : > { %v1097_v56 = vmul.f32 %v1080_v25, %v2725_v28  ;;  %v1354_v9 = vmul.f32 %v2733_v36, %v1080_v25 }
 0x1dd   : > { %v1106_v20 = vadd.f32 %v1098_v13, %v1021_v48 }
 0x1de   : > { %v1105_v59 = vadd.f32 %v1097_v56, %v1020_v30 }
 0x1df   : > { %v1138_v1 = vadd.f32 %v1130_v7, %v1106_v20 }
 0x1e0   : > { %v1137_v32 = vadd.f32 %v1129_v3, %v1105_v59 }
 0x1e1   : > { %v1170_v62 = vadd.f32 %v1162_v43, %v1138_v1 }
 0x1e2   : > { %v1169_v53 = vadd.f32 %v1161_v24, %v1137_v32 }
 0x1e3   : > { %v1202_v54 = vadd.f32 %v1194_v6, %v1170_v62 }
 0x1e4   : > { %v1201_v35 = vadd.f32 %v1193_v38, %v1169_v53 }
 0x1e5   : > { %v1234_v31 = vadd.f32 %v1226_v12, %v1202_v54 }
 0x1e6   : > { %v1233_v15 = vadd.f32 %v1225_v50, %v1201_v35 }
 0x1e7   : > { %v1266_v11 = vadd.f32 %v1258_v18, %v1234_v31 }
 0x1e8   : > { %v1265_v61 = vadd.f32 %v1257_v47, %v1233_v15 }
 0x1e9   : > { %v1298_v4 = vadd.f32 %v1290_v60, %v1266_v11 }
 0x1ea   : > { %v1297_v22 = vadd.f32 %v1289_v16, %v1265_v61 }
 0x1eb   : > { %v1330_v27 = vadd.f32 %v1322_v5, %v1298_v4 }
 0x1ec   : > { %v1329_v40 = vadd.f32 %v1321_v52, %v1297_v22 }
 0x1ed   : > { %v1362_v42 = vadd.f32 %v1354_v9, %v1330_v27 }
 0x1ee   : > { %v1361_v19 = vadd.f32 %v1353_v51, %v1329_v40 }
 0x1ef   : > { %1396 = vrot.lane.b32.xlu1 %v1362_v42, %s1734_s13 }
 0x1f0   : > { %1394 = vrot.lane.b32.xlu0 %v1361_v19, %s1734_s13 }
 0x205   : > { %v1383_v39 = vpop.permute.xlu0 %1382 }
 0x206   : > { %1663 = vmatprep.mubr.msk.f32.mxu1 %vm213_vm0, %v1383_v39 }
 0x20d   : > { %v1385_v26 = vpop.permute.xlu1 %1384 }
 0x20e   : > { %1664 = vmatmul.mubr.msk.f32.vlgmr.msra.gmra.mrb[0].mxu1 %vm213_vm0, %v1385_v26 }
 0x222   : > { %v1389_v37 = vpop.permute.xlu1 %1388 }
 0x226   : > { %v1387_v34 = vpop.permute.xlu0 %1386 }
 0x227   : > { %1666 = vmatprep.mubr.msk.f32.mxu1 %vm213_vm0, %v1387_v34 }
 0x228   : > { %1667 = vmatmul.mubr.msk.f32.gmra.mrb[2].mxu1 %vm213_vm0, %v1389_v37 }
 0x249   : > { %v1391_v8 = vpop.permute.xlu0 %1390 }
 0x24a   : > { %1669 = vmatprep.mubr.msk.f32.mxu1 %vm213_vm0, %v1391_v8 }
 0x24d   : > { %v1393_v14 = vpop.permute.xlu1 %1392 }
 0x24e   : > { %1670 = vmatmul.mubr.msk.f32.gmra.mrb[4].mxu1 %vm213_vm0, %v1393_v14 }
 0x261   : > { %v1397_v2 = vpop.permute.xlu1 %1396 }
 0x262   : > { %v1395_v49 = vpop.permute.xlu0 %1394 }
 0x263   : > { %1672 = vmatprep.mubr.msk.f32.mxu1 %vm213_vm0, %v1395_v49 }
 0x264   : > { %1673 = vmatmul.mubr.msk.f32.gmra.mrb[6].mxu1 %vm213_vm0, %v1397_v2 }
 0x2e1   : > { %v1665_v57 = vpop.f32.mrb[0].mxu1 }
 0x2e2   : > { %v1486_v21 = vadd.f32 %v1665_v57, %v1600_v46  ;;  %v1480_v63 = vpop.f32.mrb[1].mxu1 }
 0x2e3   : > { %v1481_v33 = vadd.f32 %v1600_v46, %v1480_v63 }
 0x2e4   : > { %1520 = vst.msk [vmem:[%s199_s19 + $0x8] sm:$0xff] %vm213_vm0, %v1486_v21 }
 0x2e5   : > { %1519 = vst.msk [vmem:[%s199_s19] sm:$0xff] %vm213_vm0, %v1481_v33 }
 0x2fb   : > { %v1668_v17 = vpop.f32.mrb[2].mxu1 }
 0x2fc   : > { %v1496_v30 = vadd.f32 %v1668_v17, %v1600_v46  ;;  %v1490_v55 = vpop.f32.mrb[3].mxu1 }
 0x2fd   : > { %v1491_v44 = vadd.f32 %v1600_v46, %v1490_v55 }
 0x2fe   : > { %1522 = vst.msk [vmem:[%s199_s19 + $0x18] sm:$0xff] %vm213_vm0, %v1496_v30 }
 0x2ff   : > { %1521 = vst.msk [vmem:[%s199_s19 + $0x10] sm:$0xff] %vm213_vm0, %v1491_v44 }
 0x321   : > { %v1671_v48 = vpop.f32.mrb[4].mxu1 }
 0x322   : > { %v1506_v28 = vadd.f32 %v1671_v48, %v1600_v46  ;;  %v1500_v13 = vpop.f32.mrb[5].mxu1 }
 0x323   : > { %v1501_v25 = vadd.f32 %v1600_v46, %v1500_v13 }
 0x324   : > { %1524 = vst.msk [vmem:[%s199_s19 + $0x28] sm:$0xff] %vm213_vm0, %v1506_v28 }
 0x325   : > { %1523 = vst.msk [vmem:[%s199_s19 + $0x20] sm:$0xff] %vm213_vm0, %v1501_v25 }
 0x337   : > { %v1674_v56 = vpop.f32.mrb[6].mxu1 }
 0x338   : > { %v1516_v41 = vadd.f32 %v1674_v56, %v1600_v46  ;;  %v1510_v7 = vpop.f32.mrb[7].mxu1 }
 0x339   : > { %v1511_v20 = vadd.f32 %v1600_v46, %v1510_v7 }
 0x33a   : > { %1526 = vst.msk [vmem:[%s199_s19 + $0x38] sm:$0xff] %vm213_vm0, %v1516_v41 }
 0x33b   : > { %1525 = vst.msk [vmem:[%s199_s19 + $0x30] sm:$0xff] %vm213_vm0, %v1511_v20 }
 0x33c PF: > { %s14_s15 = sadd.s32 1, %s1731_s15  }
 0x33d   : > { %p11_p4 = scmp.ge.s32.totalorder %s14_s15, 4  }
 0x33f   :  { %13 = sbr.rel (!%p11_p4) target bundleno = 1 (0x1), region = 66 }

</bundles_post_ra>
